<compile_context>
chip_gen: v7x
topology: tpu7x:2x2x1
jax: 0.10.0
libtpu: 0.0.40
codegen_flags: <defaults>
</compile_context>

<pallas_src>
import numpy as np
import jax
import jax.numpy as jnp
from jax.experimental import pallas as pl
from jax.experimental.pallas import tpu as pltpu


def channel_kernel(cof_ref, x_ref, wc_ref, ws_ref, out_ref, h_ref):
    """Fused complex L-tap FIR (full convolution) + length-M DFT of the taps.

    cof_ref: (2, B, L)            taps,   [0] = real, [1] = imag
    x_ref:   (2, B, SMK + 2L - 2) signal, zero-padded with L-1 zeros each side
    wc_ref:  (L, M)               cos(2*pi*n*t / M)
    ws_ref:  (L, M)               sin(2*pi*n*t / M)
    out_ref: (2, B, OUT)          OUT = SMK + L - 1
    h_ref:   (2, B, M)            H_true = DFT_M(taps zero-padded to M)
    """
    L = cof_ref.shape[2]
    B = cof_ref.shape[1]
    OUT = out_ref.shape[2]
    M = h_ref.shape[2]

    cr = cof_ref[0]            # (B, L)
    ci = cof_ref[1]
    xr = x_ref[0]              # (B, SMK + 2L - 2)
    xi = x_ref[1]
    wc = wc_ref[...]           # (L, M)
    ws = ws_ref[...]

    acc_r = jnp.zeros((B, OUT), jnp.float32)
    acc_i = jnp.zeros((B, OUT), jnp.float32)
    hr = jnp.zeros((B, M), jnp.float32)
    hi = jnp.zeros((B, M), jnp.float32)

    # Static unroll over the L taps — all VPU work, no MXU, no gathers.
    for t in range(L):
        crt = cr[:, t:t + 1]                 # (B, 1) broadcast along lanes
        cit = ci[:, t:t + 1]

        # Complex FIR: out[i] += cof[t] * x[i - t] via static lane windows of
        # the padded signal.
        s = L - 1 - t
        xr_t = xr[:, s:s + OUT]
        xi_t = xi[:, s:s + OUT]
        acc_r = acc_r + crt * xr_t - cit * xi_t
        acc_i = acc_i + crt * xi_t + cit * xr_t

        # DFT of the taps (zero padding beyond L contributes nothing):
        # H[n] = sum_t cof[t] * exp(-2*pi*i*n*t/M)
        wct = wc[t:t + 1]                    # (1, M) broadcast along sublanes
        wst = ws[t:t + 1]
        hr = hr + crt * wct + cit * wst
        hi = hi + cit * wct - crt * wst

    out_ref[0] = acc_r
    out_ref[1] = acc_i
    h_ref[0] = hr
    h_ref[1] = hi


def channel_pallas(cof2, xpad2, wc, ws, OUT):
    """(2,B,L) taps x (2,B,SMK+2L-2) signal -> ((2,B,OUT) conv, (2,B,M) H_true)."""
    _, B, L = cof2.shape
    SMKP = xpad2.shape[2]
    M = wc.shape[1]
    return pl.pallas_call(
        channel_kernel,
        out_shape=(
            jax.ShapeDtypeStruct((2, B, OUT), jnp.float32),
            jax.ShapeDtypeStruct((2, B, M), jnp.float32),
        ),
        grid=(1,),  # whole batch in one step: data is tiny, overhead dominates otherwise
        in_specs=[
            pl.BlockSpec((2, B, L), lambda i: (0, 0, 0)),
            pl.BlockSpec((2, B, SMKP), lambda i: (0, 0, 0)),
            pl.BlockSpec((L, M), lambda i: (0, 0)),
            pl.BlockSpec((L, M), lambda i: (0, 0)),
        ],
        out_specs=(
            pl.BlockSpec((2, B, OUT), lambda i: (0, 0, 0)),
            pl.BlockSpec((2, B, M), lambda i: (0, 0, 0)),
        ),
        compiler_params=pltpu.CompilerParams(dimension_semantics=("arbitrary",)),
    )(cof2, xpad2, wc, ws)


class Channel:
    """JAX/Pallas port of the PyTorch Channel module (original default config)."""

    def __init__(self, S=5, M=64, K=16, decay=8, L=16):
        self.S = S
        self.M = M
        self.K = K
        self.decay = decay
        self.length = L
        self.SMK = S * (M + K)
        power = jnp.exp(-jnp.arange(L, dtype=jnp.float32) / float(decay))
        power = power / jnp.sum(power)
        self.power = power.reshape(1, 1, L, 1)
        OUT = L + self.SMK - 1
        # toeplitz(arange(SMK-1, 2*SMK+L-2), arange(SMK-1, -1, -1))[i, j] == SMK-1 + i - j
        # Kept only for reference / parity; the kernel exploits the Toeplitz
        # structure directly and never materializes it.
        self.index = (self.SMK - 1) + np.arange(OUT)[:, None] - np.arange(self.SMK)[None, :]
        # DFT-of-taps tables (only the first L columns of the M-point DFT matter).
        t = np.arange(L, dtype=np.float64)[:, None]
        n = np.arange(M, dtype=np.float64)[None, :]
        theta = 2.0 * np.pi * t * n / float(M)
        self.dft_cos = jnp.asarray(np.cos(theta), dtype=jnp.float32)   # (L, M)
        self.dft_sin = jnp.asarray(np.sin(theta), dtype=jnp.float32)   # (L, M)

    def forward(self, x, cof=None, key=None):
        N, P, SMK, _ = x.shape
        assert SMK == self.SMK, "input SMK must match S*(M+K)"
        L, M = self.length, self.M
        OUT = L + SMK - 1
        B = N * P

        if cof is None:
            cof = jnp.sqrt(self.power / 2.0) * jax.random.normal(
                key, (N, P, L, 2), dtype=jnp.float32
            )

        # Layout glue (plain JAX): (real, imag)-major with the long axis last
        # (lane-dense), whole batch as one slab; zero-pad for the full conv.
        cof2 = jnp.transpose(cof.reshape(B, L, 2), (2, 0, 1))         # (2, B, L)
        x2 = jnp.transpose(x.reshape(B, SMK, 2), (2, 0, 1))           # (2, B, SMK)
        xpad2 = jnp.pad(x2, ((0, 0), (0, 0), (L - 1, L - 1)))         # (2, B, SMK+2L-2)

        out2, h2 = channel_pallas(cof2, xpad2, self.dft_cos, self.dft_sin, OUT)
        out = jnp.transpose(out2, (1, 2, 0)).reshape(N, P, OUT, 2)
        H_true = jnp.transpose(h2, (1, 2, 0)).reshape(N, P, M, 2)
        return out, H_true


if __name__ == "__main__":
    key = jax.random.PRNGKey(0)
    k_in, k_cof = jax.random.split(key)

    # Original module defaults: S=5, M=64, K=16, decay=8, L=16 -> SMK=400.
    ch = Channel(S=5, M=64, K=16, decay=8, L=16)
    N, P = 2, 2
    SMK, L, M = ch.SMK, ch.length, ch.M

    x = jax.random.normal(k_in, (N, P, SMK, 2), dtype=jnp.float32)
    cof = jnp.sqrt(ch.power / 2.0) * jax.random.normal(k_cof, (N, P, L, 2), jnp.float32)

    out, H_true = ch.forward(x, cof=cof)
    out = jax.block_until_ready(out)
    H_true = jax.block_until_ready(H_true)

    # Correctness check against a plain-JAX reference of the original
    # Toeplitz-matrix bmm + FFT formulation (same cof).
    zpad = jnp.zeros((N, P, SMK - 1, 2), jnp.float32)
    cof_padded = jnp.concatenate([zpad, cof, zpad], axis=2)
    chan = cof_padded[:, :, ch.index, :]                    # (N, P, OUT, SMK, 2)
    Hr = chan[..., 0].reshape(N * P, -1, SMK)
    Hi = chan[..., 1].reshape(N * P, -1, SMK)
    sr = x.reshape(N * P, SMK, 2)[..., 0:1]
    si = x.reshape(N * P, SMK, 2)[..., 1:2]
    hp = jax.lax.Precision.HIGHEST
    ref_r = (jnp.einsum("bok,bkl->bol", Hr, sr, precision=hp)
             - jnp.einsum("bok,bkl->bol", Hi, si, precision=hp))
    ref_i = (jnp.einsum("bok,bkl->bol", Hr, si, precision=hp)
             + jnp.einsum("bok,bkl->bol", Hi, sr, precision=hp))
    ref_out = jnp.concatenate([ref_r, ref_i], axis=-1).reshape(N, P, -1, 2)

    cof_true = jnp.concatenate([cof, jnp.zeros((N, P, M - L, 2), jnp.float32)], axis=2)
    h_cplx = jnp.fft.fft(cof_true[..., 0] + 1j * cof_true[..., 1], axis=-1)
    ref_H = jnp.stack([jnp.real(h_cplx), jnp.imag(h_cplx)], axis=-1).astype(jnp.float32)

    np.testing.assert_allclose(np.asarray(out), np.asarray(ref_out), rtol=1e-4, atol=1e-4)
    np.testing.assert_allclose(np.asarray(H_true), np.asarray(ref_H), rtol=1e-4, atol=1e-4)

    print("KERNEL_OK")
</pallas_src>

<mosaic_0001>
module attributes {stable_mosaic.version = 11 : i64} {
  func.func @channel_kernel(%arg0: i32, %arg1: memref<2x4x16xf32, #tpu.memory_space<vmem>>, %arg2: memref<2x4x430xf32, #tpu.memory_space<vmem>>, %arg3: memref<16x64xf32, #tpu.memory_space<vmem>>, %arg4: memref<16x64xf32, #tpu.memory_space<vmem>>, %arg5: memref<2x4x415xf32, #tpu.memory_space<vmem>>, %arg6: memref<2x4x64xf32, #tpu.memory_space<vmem>>) attributes {dimension_semantics = [#tpu.dimension_semantics<arbitrary>], iteration_bounds = array<i64: 1>, scalar_prefetch = 0 : i64, scratch_operands = 0 : i64, tpu.core_type = #tpu.core_type<tc>, window_params = [{pipeline_mode = #tpu.pipeline_mode<synchronous>, transform_indices = @transform_0, window_bounds = array<i64: 2, 4, 16>}, {pipeline_mode = #tpu.pipeline_mode<synchronous>, transform_indices = @transform_1, window_bounds = array<i64: 2, 4, 430>}, {pipeline_mode = #tpu.pipeline_mode<synchronous>, transform_indices = @transform_2, window_bounds = array<i64: 16, 64>}, {pipeline_mode = #tpu.pipeline_mode<synchronous>, transform_indices = @transform_3, window_bounds = array<i64: 16, 64>}, {pipeline_mode = #tpu.pipeline_mode<synchronous>, transform_indices = @transform_4, window_bounds = array<i64: 2, 4, 415>}, {pipeline_mode = #tpu.pipeline_mode<synchronous>, transform_indices = @transform_5, window_bounds = array<i64: 2, 4, 64>}]} {
    %c0 = arith.constant 0 : index
    %c0_0 = arith.constant 0 : index
    %c0_1 = arith.constant 0 : index
    %0 = vector.load %arg1[%c0, %c0_0, %c0_1] : memref<2x4x16xf32, #tpu.memory_space<vmem>>, vector<1x4x16xf32>
    %1 = vector.shape_cast %0 : vector<1x4x16xf32> to vector<4x16xf32>
    %c1 = arith.constant 1 : index
    %c0_2 = arith.constant 0 : index
    %c0_3 = arith.constant 0 : index
    %2 = vector.load %arg1[%c1, %c0_2, %c0_3] : memref<2x4x16xf32, #tpu.memory_space<vmem>>, vector<1x4x16xf32>
    %3 = vector.shape_cast %2 : vector<1x4x16xf32> to vector<4x16xf32>
    %c0_4 = arith.constant 0 : index
    %c0_5 = arith.constant 0 : index
    %c0_6 = arith.constant 0 : index
    %4 = vector.load %arg2[%c0_4, %c0_5, %c0_6] : memref<2x4x430xf32, #tpu.memory_space<vmem>>, vector<1x4x430xf32>
    %5 = vector.shape_cast %4 : vector<1x4x430xf32> to vector<4x430xf32>
    %c1_7 = arith.constant 1 : index
    %c0_8 = arith.constant 0 : index
    %c0_9 = arith.constant 0 : index
    %6 = vector.load %arg2[%c1_7, %c0_8, %c0_9] : memref<2x4x430xf32, #tpu.memory_space<vmem>>, vector<1x4x430xf32>
    %7 = vector.shape_cast %6 : vector<1x4x430xf32> to vector<4x430xf32>
    %c0_10 = arith.constant 0 : index
    %c0_11 = arith.constant 0 : index
    %8 = vector.load %arg3[%c0_10, %c0_11] : memref<16x64xf32, #tpu.memory_space<vmem>>, vector<16x64xf32>
    %c0_12 = arith.constant 0 : index
    %c0_13 = arith.constant 0 : index
    %9 = vector.load %arg4[%c0_12, %c0_13] : memref<16x64xf32, #tpu.memory_space<vmem>>, vector<16x64xf32>
    %cst = arith.constant 0.000000e+00 : f32
    %10 = vector.broadcast %cst : f32 to vector<4x415xf32>
    %cst_14 = arith.constant 0.000000e+00 : f32
    %11 = vector.broadcast %cst_14 : f32 to vector<4x415xf32>
    %cst_15 = arith.constant 0.000000e+00 : f32
    %12 = vector.broadcast %cst_15 : f32 to vector<4x64xf32>
    %cst_16 = arith.constant 0.000000e+00 : f32
    %13 = vector.broadcast %cst_16 : f32 to vector<4x64xf32>
    %14 = vector.extract_strided_slice %1 {offsets = [0, 0], sizes = [4, 1], strides = [1, 1]} : vector<4x16xf32> to vector<4x1xf32>
    %15 = vector.extract_strided_slice %3 {offsets = [0, 0], sizes = [4, 1], strides = [1, 1]} : vector<4x16xf32> to vector<4x1xf32>
    %16 = vector.extract_strided_slice %5 {offsets = [0, 15], sizes = [4, 415], strides = [1, 1]} : vector<4x430xf32> to vector<4x415xf32>
    %17 = vector.extract_strided_slice %7 {offsets = [0, 15], sizes = [4, 415], strides = [1, 1]} : vector<4x430xf32> to vector<4x415xf32>
    %18 = vector.broadcast %14 : vector<4x1xf32> to vector<4x415xf32>
    %19 = arith.mulf %18, %16 : vector<4x415xf32>
    %20 = arith.addf %10, %19 : vector<4x415xf32>
    %21 = vector.broadcast %15 : vector<4x1xf32> to vector<4x415xf32>
    %22 = arith.mulf %21, %17 : vector<4x415xf32>
    %23 = arith.subf %20, %22 : vector<4x415xf32>
    %24 = vector.broadcast %14 : vector<4x1xf32> to vector<4x415xf32>
    %25 = arith.mulf %24, %17 : vector<4x415xf32>
    %26 = arith.addf %11, %25 : vector<4x415xf32>
    %27 = vector.broadcast %15 : vector<4x1xf32> to vector<4x415xf32>
    %28 = arith.mulf %27, %16 : vector<4x415xf32>
    %29 = arith.addf %26, %28 : vector<4x415xf32>
    %30 = vector.extract_strided_slice %8 {offsets = [0, 0], sizes = [1, 64], strides = [1, 1]} : vector<16x64xf32> to vector<1x64xf32>
    %31 = vector.extract_strided_slice %9 {offsets = [0, 0], sizes = [1, 64], strides = [1, 1]} : vector<16x64xf32> to vector<1x64xf32>
    %32 = vector.broadcast %14 : vector<4x1xf32> to vector<4x64xf32>
    %33 = vector.broadcast %30 : vector<1x64xf32> to vector<4x64xf32>
    %34 = arith.mulf %32, %33 : vector<4x64xf32>
    %35 = arith.addf %12, %34 : vector<4x64xf32>
    %36 = vector.broadcast %15 : vector<4x1xf32> to vector<4x64xf32>
    %37 = vector.broadcast %31 : vector<1x64xf32> to vector<4x64xf32>
    %38 = arith.mulf %36, %37 : vector<4x64xf32>
    %39 = arith.addf %35, %38 : vector<4x64xf32>
    %40 = vector.broadcast %15 : vector<4x1xf32> to vector<4x64xf32>
    %41 = vector.broadcast %30 : vector<1x64xf32> to vector<4x64xf32>
    %42 = arith.mulf %40, %41 : vector<4x64xf32>
    %43 = arith.addf %13, %42 : vector<4x64xf32>
    %44 = vector.broadcast %14 : vector<4x1xf32> to vector<4x64xf32>
    %45 = vector.broadcast %31 : vector<1x64xf32> to vector<4x64xf32>
    %46 = arith.mulf %44, %45 : vector<4x64xf32>
    %47 = arith.subf %43, %46 : vector<4x64xf32>
    %48 = vector.extract_strided_slice %1 {offsets = [0, 1], sizes = [4, 1], strides = [1, 1]} : vector<4x16xf32> to vector<4x1xf32>
    %49 = vector.extract_strided_slice %3 {offsets = [0, 1], sizes = [4, 1], strides = [1, 1]} : vector<4x16xf32> to vector<4x1xf32>
    %50 = vector.extract_strided_slice %5 {offsets = [0, 14], sizes = [4, 415], strides = [1, 1]} : vector<4x430xf32> to vector<4x415xf32>
    %51 = vector.extract_strided_slice %7 {offsets = [0, 14], sizes = [4, 415], strides = [1, 1]} : vector<4x430xf32> to vector<4x415xf32>
    %52 = vector.broadcast %48 : vector<4x1xf32> to vector<4x415xf32>
    %53 = arith.mulf %52, %50 : vector<4x415xf32>
    %54 = arith.addf %23, %53 : vector<4x415xf32>
    %55 = vector.broadcast %49 : vector<4x1xf32> to vector<4x415xf32>
    %56 = arith.mulf %55, %51 : vector<4x415xf32>
    %57 = arith.subf %54, %56 : vector<4x415xf32>
    %58 = vector.broadcast %48 : vector<4x1xf32> to vector<4x415xf32>
    %59 = arith.mulf %58, %51 : vector<4x415xf32>
    %60 = arith.addf %29, %59 : vector<4x415xf32>
    %61 = vector.broadcast %49 : vector<4x1xf32> to vector<4x415xf32>
    %62 = arith.mulf %61, %50 : vector<4x415xf32>
    %63 = arith.addf %60, %62 : vector<4x415xf32>
    %64 = vector.extract_strided_slice %8 {offsets = [1, 0], sizes = [1, 64], strides = [1, 1]} : vector<16x64xf32> to vector<1x64xf32>
    %65 = vector.extract_strided_slice %9 {offsets = [1, 0], sizes = [1, 64], strides = [1, 1]} : vector<16x64xf32> to vector<1x64xf32>
    %66 = vector.broadcast %48 : vector<4x1xf32> to vector<4x64xf32>
    %67 = vector.broadcast %64 : vector<1x64xf32> to vector<4x64xf32>
    %68 = arith.mulf %66, %67 : vector<4x64xf32>
    %69 = arith.addf %39, %68 : vector<4x64xf32>
    %70 = vector.broadcast %49 : vector<4x1xf32> to vector<4x64xf32>
    %71 = vector.broadcast %65 : vector<1x64xf32> to vector<4x64xf32>
    %72 = arith.mulf %70, %71 : vector<4x64xf32>
    %73 = arith.addf %69, %72 : vector<4x64xf32>
    %74 = vector.broadcast %49 : vector<4x1xf32> to vector<4x64xf32>
    %75 = vector.broadcast %64 : vector<1x64xf32> to vector<4x64xf32>
    %76 = arith.mulf %74, %75 : vector<4x64xf32>
    %77 = arith.addf %47, %76 : vector<4x64xf32>
    %78 = vector.broadcast %48 : vector<4x1xf32> to vector<4x64xf32>
    %79 = vector.broadcast %65 : vector<1x64xf32> to vector<4x64xf32>
    %80 = arith.mulf %78, %79 : vector<4x64xf32>
    %81 = arith.subf %77, %80 : vector<4x64xf32>
    %82 = vector.extract_strided_slice %1 {offsets = [0, 2], sizes = [4, 1], strides = [1, 1]} : vector<4x16xf32> to vector<4x1xf32>
    %83 = vector.extract_strided_slice %3 {offsets = [0, 2], sizes = [4, 1], strides = [1, 1]} : vector<4x16xf32> to vector<4x1xf32>
    %84 = vector.extract_strided_slice %5 {offsets = [0, 13], sizes = [4, 415], strides = [1, 1]} : vector<4x430xf32> to vector<4x415xf32>
    %85 = vector.extract_strided_slice %7 {offsets = [0, 13], sizes = [4, 415], strides = [1, 1]} : vector<4x430xf32> to vector<4x415xf32>
    %86 = vector.broadcast %82 : vector<4x1xf32> to vector<4x415xf32>
    %87 = arith.mulf %86, %84 : vector<4x415xf32>
    %88 = arith.addf %57, %87 : vector<4x415xf32>
    %89 = vector.broadcast %83 : vector<4x1xf32> to vector<4x415xf32>
    %90 = arith.mulf %89, %85 : vector<4x415xf32>
    %91 = arith.subf %88, %90 : vector<4x415xf32>
    %92 = vector.broadcast %82 : vector<4x1xf32> to vector<4x415xf32>
    %93 = arith.mulf %92, %85 : vector<4x415xf32>
    %94 = arith.addf %63, %93 : vector<4x415xf32>
    %95 = vector.broadcast %83 : vector<4x1xf32> to vector<4x415xf32>
    %96 = arith.mulf %95, %84 : vector<4x415xf32>
    %97 = arith.addf %94, %96 : vector<4x415xf32>
    %98 = vector.extract_strided_slice %8 {offsets = [2, 0], sizes = [1, 64], strides = [1, 1]} : vector<16x64xf32> to vector<1x64xf32>
    %99 = vector.extract_strided_slice %9 {offsets = [2, 0], sizes = [1, 64], strides = [1, 1]} : vector<16x64xf32> to vector<1x64xf32>
    %100 = vector.broadcast %82 : vector<4x1xf32> to vector<4x64xf32>
    %101 = vector.broadcast %98 : vector<1x64xf32> to vector<4x64xf32>
    %102 = arith.mulf %100, %101 : vector<4x64xf32>
    %103 = arith.addf %73, %102 : vector<4x64xf32>
    %104 = vector.broadcast %83 : vector<4x1xf32> to vector<4x64xf32>
    %105 = vector.broadcast %99 : vector<1x64xf32> to vector<4x64xf32>
    %106 = arith.mulf %104, %105 : vector<4x64xf32>
    %107 = arith.addf %103, %106 : vector<4x64xf32>
    %108 = vector.broadcast %83 : vector<4x1xf32> to vector<4x64xf32>
    %109 = vector.broadcast %98 : vector<1x64xf32> to vector<4x64xf32>
    %110 = arith.mulf %108, %109 : vector<4x64xf32>
    %111 = arith.addf %81, %110 : vector<4x64xf32>
    %112 = vector.broadcast %82 : vector<4x1xf32> to vector<4x64xf32>
    %113 = vector.broadcast %99 : vector<1x64xf32> to vector<4x64xf32>
    %114 = arith.mulf %112, %113 : vector<4x64xf32>
    %115 = arith.subf %111, %114 : vector<4x64xf32>
    %116 = vector.extract_strided_slice %1 {offsets = [0, 3], sizes = [4, 1], strides = [1, 1]} : vector<4x16xf32> to vector<4x1xf32>
    %117 = vector.extract_strided_slice %3 {offsets = [0, 3], sizes = [4, 1], strides = [1, 1]} : vector<4x16xf32> to vector<4x1xf32>
    %118 = vector.extract_strided_slice %5 {offsets = [0, 12], sizes = [4, 415], strides = [1, 1]} : vector<4x430xf32> to vector<4x415xf32>
    %119 = vector.extract_strided_slice %7 {offsets = [0, 12], sizes = [4, 415], strides = [1, 1]} : vector<4x430xf32> to vector<4x415xf32>
    %120 = vector.broadcast %116 : vector<4x1xf32> to vector<4x415xf32>
    %121 = arith.mulf %120, %118 : vector<4x415xf32>
    %122 = arith.addf %91, %121 : vector<4x415xf32>
    %123 = vector.broadcast %117 : vector<4x1xf32> to vector<4x415xf32>
    %124 = arith.mulf %123, %119 : vector<4x415xf32>
    %125 = arith.subf %122, %124 : vector<4x415xf32>
    %126 = vector.broadcast %116 : vector<4x1xf32> to vector<4x415xf32>
    %127 = arith.mulf %126, %119 : vector<4x415xf32>
    %128 = arith.addf %97, %127 : vector<4x415xf32>
    %129 = vector.broadcast %117 : vector<4x1xf32> to vector<4x415xf32>
    %130 = arith.mulf %129, %118 : vector<4x415xf32>
    %131 = arith.addf %128, %130 : vector<4x415xf32>
    %132 = vector.extract_strided_slice %8 {offsets = [3, 0], sizes = [1, 64], strides = [1, 1]} : vector<16x64xf32> to vector<1x64xf32>
    %133 = vector.extract_strided_slice %9 {offsets = [3, 0], sizes = [1, 64], strides = [1, 1]} : vector<16x64xf32> to vector<1x64xf32>
    %134 = vector.broadcast %116 : vector<4x1xf32> to vector<4x64xf32>
    %135 = vector.broadcast %132 : vector<1x64xf32> to vector<4x64xf32>
    %136 = arith.mulf %134, %135 : vector<4x64xf32>
    %137 = arith.addf %107, %136 : vector<4x64xf32>
    %138 = vector.broadcast %117 : vector<4x1xf32> to vector<4x64xf32>
    %139 = vector.broadcast %133 : vector<1x64xf32> to vector<4x64xf32>
    %140 = arith.mulf %138, %139 : vector<4x64xf32>
    %141 = arith.addf %137, %140 : vector<4x64xf32>
    %142 = vector.broadcast %117 : vector<4x1xf32> to vector<4x64xf32>
    %143 = vector.broadcast %132 : vector<1x64xf32> to vector<4x64xf32>
    %144 = arith.mulf %142, %143 : vector<4x64xf32>
    %145 = arith.addf %115, %144 : vector<4x64xf32>
    %146 = vector.broadcast %116 : vector<4x1xf32> to vector<4x64xf32>
    %147 = vector.broadcast %133 : vector<1x64xf32> to vector<4x64xf32>
    %148 = arith.mulf %146, %147 : vector<4x64xf32>
    %149 = arith.subf %145, %148 : vector<4x64xf32>
    %150 = vector.extract_strided_slice %1 {offsets = [0, 4], sizes = [4, 1], strides = [1, 1]} : vector<4x16xf32> to vector<4x1xf32>
    %151 = vector.extract_strided_slice %3 {offsets = [0, 4], sizes = [4, 1], strides = [1, 1]} : vector<4x16xf32> to vector<4x1xf32>
    %152 = vector.extract_strided_slice %5 {offsets = [0, 11], sizes = [4, 415], strides = [1, 1]} : vector<4x430xf32> to vector<4x415xf32>
    %153 = vector.extract_strided_slice %7 {offsets = [0, 11], sizes = [4, 415], strides = [1, 1]} : vector<4x430xf32> to vector<4x415xf32>
    %154 = vector.broadcast %150 : vector<4x1xf32> to vector<4x415xf32>
    %155 = arith.mulf %154, %152 : vector<4x415xf32>
    %156 = arith.addf %125, %155 : vector<4x415xf32>
    %157 = vector.broadcast %151 : vector<4x1xf32> to vector<4x415xf32>
    %158 = arith.mulf %157, %153 : vector<4x415xf32>
    %159 = arith.subf %156, %158 : vector<4x415xf32>
    %160 = vector.broadcast %150 : vector<4x1xf32> to vector<4x415xf32>
    %161 = arith.mulf %160, %153 : vector<4x415xf32>
    %162 = arith.addf %131, %161 : vector<4x415xf32>
    %163 = vector.broadcast %151 : vector<4x1xf32> to vector<4x415xf32>
    %164 = arith.mulf %163, %152 : vector<4x415xf32>
    %165 = arith.addf %162, %164 : vector<4x415xf32>
    %166 = vector.extract_strided_slice %8 {offsets = [4, 0], sizes = [1, 64], strides = [1, 1]} : vector<16x64xf32> to vector<1x64xf32>
    %167 = vector.extract_strided_slice %9 {offsets = [4, 0], sizes = [1, 64], strides = [1, 1]} : vector<16x64xf32> to vector<1x64xf32>
    %168 = vector.broadcast %150 : vector<4x1xf32> to vector<4x64xf32>
    %169 = vector.broadcast %166 : vector<1x64xf32> to vector<4x64xf32>
    %170 = arith.mulf %168, %169 : vector<4x64xf32>
    %171 = arith.addf %141, %170 : vector<4x64xf32>
    %172 = vector.broadcast %151 : vector<4x1xf32> to vector<4x64xf32>
    %173 = vector.broadcast %167 : vector<1x64xf32> to vector<4x64xf32>
    %174 = arith.mulf %172, %173 : vector<4x64xf32>
    %175 = arith.addf %171, %174 : vector<4x64xf32>
    %176 = vector.broadcast %151 : vector<4x1xf32> to vector<4x64xf32>
    %177 = vector.broadcast %166 : vector<1x64xf32> to vector<4x64xf32>
    %178 = arith.mulf %176, %177 : vector<4x64xf32>
    %179 = arith.addf %149, %178 : vector<4x64xf32>
    %180 = vector.broadcast %150 : vector<4x1xf32> to vector<4x64xf32>
    %181 = vector.broadcast %167 : vector<1x64xf32> to vector<4x64xf32>
    %182 = arith.mulf %180, %181 : vector<4x64xf32>
    %183 = arith.subf %179, %182 : vector<4x64xf32>
    %184 = vector.extract_strided_slice %1 {offsets = [0, 5], sizes = [4, 1], strides = [1, 1]} : vector<4x16xf32> to vector<4x1xf32>
    %185 = vector.extract_strided_slice %3 {offsets = [0, 5], sizes = [4, 1], strides = [1, 1]} : vector<4x16xf32> to vector<4x1xf32>
    %186 = vector.extract_strided_slice %5 {offsets = [0, 10], sizes = [4, 415], strides = [1, 1]} : vector<4x430xf32> to vector<4x415xf32>
    %187 = vector.extract_strided_slice %7 {offsets = [0, 10], sizes = [4, 415], strides = [1, 1]} : vector<4x430xf32> to vector<4x415xf32>
    %188 = vector.broadcast %184 : vector<4x1xf32> to vector<4x415xf32>
    %189 = arith.mulf %188, %186 : vector<4x415xf32>
    %190 = arith.addf %159, %189 : vector<4x415xf32>
    %191 = vector.broadcast %185 : vector<4x1xf32> to vector<4x415xf32>
    %192 = arith.mulf %191, %187 : vector<4x415xf32>
    %193 = arith.subf %190, %192 : vector<4x415xf32>
    %194 = vector.broadcast %184 : vector<4x1xf32> to vector<4x415xf32>
    %195 = arith.mulf %194, %187 : vector<4x415xf32>
    %196 = arith.addf %165, %195 : vector<4x415xf32>
    %197 = vector.broadcast %185 : vector<4x1xf32> to vector<4x415xf32>
    %198 = arith.mulf %197, %186 : vector<4x415xf32>
    %199 = arith.addf %196, %198 : vector<4x415xf32>
    %200 = vector.extract_strided_slice %8 {offsets = [5, 0], sizes = [1, 64], strides = [1, 1]} : vector<16x64xf32> to vector<1x64xf32>
    %201 = vector.extract_strided_slice %9 {offsets = [5, 0], sizes = [1, 64], strides = [1, 1]} : vector<16x64xf32> to vector<1x64xf32>
    %202 = vector.broadcast %184 : vector<4x1xf32> to vector<4x64xf32>
    %203 = vector.broadcast %200 : vector<1x64xf32> to vector<4x64xf32>
    %204 = arith.mulf %202, %203 : vector<4x64xf32>
    %205 = arith.addf %175, %204 : vector<4x64xf32>
    %206 = vector.broadcast %185 : vector<4x1xf32> to vector<4x64xf32>
    %207 = vector.broadcast %201 : vector<1x64xf32> to vector<4x64xf32>
    %208 = arith.mulf %206, %207 : vector<4x64xf32>
    %209 = arith.addf %205, %208 : vector<4x64xf32>
    %210 = vector.broadcast %185 : vector<4x1xf32> to vector<4x64xf32>
    %211 = vector.broadcast %200 : vector<1x64xf32> to vector<4x64xf32>
    %212 = arith.mulf %210, %211 : vector<4x64xf32>
    %213 = arith.addf %183, %212 : vector<4x64xf32>
    %214 = vector.broadcast %184 : vector<4x1xf32> to vector<4x64xf32>
    %215 = vector.broadcast %201 : vector<1x64xf32> to vector<4x64xf32>
    %216 = arith.mulf %214, %215 : vector<4x64xf32>
    %217 = arith.subf %213, %216 : vector<4x64xf32>
    %218 = vector.extract_strided_slice %1 {offsets = [0, 6], sizes = [4, 1], strides = [1, 1]} : vector<4x16xf32> to vector<4x1xf32>
    %219 = vector.extract_strided_slice %3 {offsets = [0, 6], sizes = [4, 1], strides = [1, 1]} : vector<4x16xf32> to vector<4x1xf32>
    %220 = vector.extract_strided_slice %5 {offsets = [0, 9], sizes = [4, 415], strides = [1, 1]} : vector<4x430xf32> to vector<4x415xf32>
    %221 = vector.extract_strided_slice %7 {offsets = [0, 9], sizes = [4, 415], strides = [1, 1]} : vector<4x430xf32> to vector<4x415xf32>
    %222 = vector.broadcast %218 : vector<4x1xf32> to vector<4x415xf32>
    %223 = arith.mulf %222, %220 : vector<4x415xf32>
    %224 = arith.addf %193, %223 : vector<4x415xf32>
    %225 = vector.broadcast %219 : vector<4x1xf32> to vector<4x415xf32>
    %226 = arith.mulf %225, %221 : vector<4x415xf32>
    %227 = arith.subf %224, %226 : vector<4x415xf32>
    %228 = vector.broadcast %218 : vector<4x1xf32> to vector<4x415xf32>
    %229 = arith.mulf %228, %221 : vector<4x415xf32>
    %230 = arith.addf %199, %229 : vector<4x415xf32>
    %231 = vector.broadcast %219 : vector<4x1xf32> to vector<4x415xf32>
    %232 = arith.mulf %231, %220 : vector<4x415xf32>
    %233 = arith.addf %230, %232 : vector<4x415xf32>
    %234 = vector.extract_strided_slice %8 {offsets = [6, 0], sizes = [1, 64], strides = [1, 1]} : vector<16x64xf32> to vector<1x64xf32>
    %235 = vector.extract_strided_slice %9 {offsets = [6, 0], sizes = [1, 64], strides = [1, 1]} : vector<16x64xf32> to vector<1x64xf32>
    %236 = vector.broadcast %218 : vector<4x1xf32> to vector<4x64xf32>
    %237 = vector.broadcast %234 : vector<1x64xf32> to vector<4x64xf32>
    %238 = arith.mulf %236, %237 : vector<4x64xf32>
    %239 = arith.addf %209, %238 : vector<4x64xf32>
    %240 = vector.broadcast %219 : vector<4x1xf32> to vector<4x64xf32>
    %241 = vector.broadcast %235 : vector<1x64xf32> to vector<4x64xf32>
    %242 = arith.mulf %240, %241 : vector<4x64xf32>
    %243 = arith.addf %239, %242 : vector<4x64xf32>
    %244 = vector.broadcast %219 : vector<4x1xf32> to vector<4x64xf32>
    %245 = vector.broadcast %234 : vector<1x64xf32> to vector<4x64xf32>
    %246 = arith.mulf %244, %245 : vector<4x64xf32>
    %247 = arith.addf %217, %246 : vector<4x64xf32>
    %248 = vector.broadcast %218 : vector<4x1xf32> to vector<4x64xf32>
    %249 = vector.broadcast %235 : vector<1x64xf32> to vector<4x64xf32>
    %250 = arith.mulf %248, %249 : vector<4x64xf32>
    %251 = arith.subf %247, %250 : vector<4x64xf32>
    %252 = vector.extract_strided_slice %1 {offsets = [0, 7], sizes = [4, 1], strides = [1, 1]} : vector<4x16xf32> to vector<4x1xf32>
    %253 = vector.extract_strided_slice %3 {offsets = [0, 7], sizes = [4, 1], strides = [1, 1]} : vector<4x16xf32> to vector<4x1xf32>
    %254 = vector.extract_strided_slice %5 {offsets = [0, 8], sizes = [4, 415], strides = [1, 1]} : vector<4x430xf32> to vector<4x415xf32>
    %255 = vector.extract_strided_slice %7 {offsets = [0, 8], sizes = [4, 415], strides = [1, 1]} : vector<4x430xf32> to vector<4x415xf32>
    %256 = vector.broadcast %252 : vector<4x1xf32> to vector<4x415xf32>
    %257 = arith.mulf %256, %254 : vector<4x415xf32>
    %258 = arith.addf %227, %257 : vector<4x415xf32>
    %259 = vector.broadcast %253 : vector<4x1xf32> to vector<4x415xf32>
    %260 = arith.mulf %259, %255 : vector<4x415xf32>
    %261 = arith.subf %258, %260 : vector<4x415xf32>
    %262 = vector.broadcast %252 : vector<4x1xf32> to vector<4x415xf32>
    %263 = arith.mulf %262, %255 : vector<4x415xf32>
    %264 = arith.addf %233, %263 : vector<4x415xf32>
    %265 = vector.broadcast %253 : vector<4x1xf32> to vector<4x415xf32>
    %266 = arith.mulf %265, %254 : vector<4x415xf32>
    %267 = arith.addf %264, %266 : vector<4x415xf32>
    %268 = vector.extract_strided_slice %8 {offsets = [7, 0], sizes = [1, 64], strides = [1, 1]} : vector<16x64xf32> to vector<1x64xf32>
    %269 = vector.extract_strided_slice %9 {offsets = [7, 0], sizes = [1, 64], strides = [1, 1]} : vector<16x64xf32> to vector<1x64xf32>
    %270 = vector.broadcast %252 : vector<4x1xf32> to vector<4x64xf32>
    %271 = vector.broadcast %268 : vector<1x64xf32> to vector<4x64xf32>
    %272 = arith.mulf %270, %271 : vector<4x64xf32>
    %273 = arith.addf %243, %272 : vector<4x64xf32>
    %274 = vector.broadcast %253 : vector<4x1xf32> to vector<4x64xf32>
    %275 = vector.broadcast %269 : vector<1x64xf32> to vector<4x64xf32>
    %276 = arith.mulf %274, %275 : vector<4x64xf32>
    %277 = arith.addf %273, %276 : vector<4x64xf32>
    %278 = vector.broadcast %253 : vector<4x1xf32> to vector<4x64xf32>
    %279 = vector.broadcast %268 : vector<1x64xf32> to vector<4x64xf32>
    %280 = arith.mulf %278, %279 : vector<4x64xf32>
    %281 = arith.addf %251, %280 : vector<4x64xf32>
    %282 = vector.broadcast %252 : vector<4x1xf32> to vector<4x64xf32>
    %283 = vector.broadcast %269 : vector<1x64xf32> to vector<4x64xf32>
    %284 = arith.mulf %282, %283 : vector<4x64xf32>
    %285 = arith.subf %281, %284 : vector<4x64xf32>
    %286 = vector.extract_strided_slice %1 {offsets = [0, 8], sizes = [4, 1], strides = [1, 1]} : vector<4x16xf32> to vector<4x1xf32>
    %287 = vector.extract_strided_slice %3 {offsets = [0, 8], sizes = [4, 1], strides = [1, 1]} : vector<4x16xf32> to vector<4x1xf32>
    %288 = vector.extract_strided_slice %5 {offsets = [0, 7], sizes = [4, 415], strides = [1, 1]} : vector<4x430xf32> to vector<4x415xf32>
    %289 = vector.extract_strided_slice %7 {offsets = [0, 7], sizes = [4, 415], strides = [1, 1]} : vector<4x430xf32> to vector<4x415xf32>
    %290 = vector.broadcast %286 : vector<4x1xf32> to vector<4x415xf32>
    %291 = arith.mulf %290, %288 : vector<4x415xf32>
    %292 = arith.addf %261, %291 : vector<4x415xf32>
    %293 = vector.broadcast %287 : vector<4x1xf32> to vector<4x415xf32>
    %294 = arith.mulf %293, %289 : vector<4x415xf32>
    %295 = arith.subf %292, %294 : vector<4x415xf32>
    %296 = vector.broadcast %286 : vector<4x1xf32> to vector<4x415xf32>
    %297 = arith.mulf %296, %289 : vector<4x415xf32>
    %298 = arith.addf %267, %297 : vector<4x415xf32>
    %299 = vector.broadcast %287 : vector<4x1xf32> to vector<4x415xf32>
    %300 = arith.mulf %299, %288 : vector<4x415xf32>
    %301 = arith.addf %298, %300 : vector<4x415xf32>
    %302 = vector.extract_strided_slice %8 {offsets = [8, 0], sizes = [1, 64], strides = [1, 1]} : vector<16x64xf32> to vector<1x64xf32>
    %303 = vector.extract_strided_slice %9 {offsets = [8, 0], sizes = [1, 64], strides = [1, 1]} : vector<16x64xf32> to vector<1x64xf32>
    %304 = vector.broadcast %286 : vector<4x1xf32> to vector<4x64xf32>
    %305 = vector.broadcast %302 : vector<1x64xf32> to vector<4x64xf32>
    %306 = arith.mulf %304, %305 : vector<4x64xf32>
    %307 = arith.addf %277, %306 : vector<4x64xf32>
    %308 = vector.broadcast %287 : vector<4x1xf32> to vector<4x64xf32>
    %309 = vector.broadcast %303 : vector<1x64xf32> to vector<4x64xf32>
    %310 = arith.mulf %308, %309 : vector<4x64xf32>
    %311 = arith.addf %307, %310 : vector<4x64xf32>
    %312 = vector.broadcast %287 : vector<4x1xf32> to vector<4x64xf32>
    %313 = vector.broadcast %302 : vector<1x64xf32> to vector<4x64xf32>
    %314 = arith.mulf %312, %313 : vector<4x64xf32>
    %315 = arith.addf %285, %314 : vector<4x64xf32>
    %316 = vector.broadcast %286 : vector<4x1xf32> to vector<4x64xf32>
    %317 = vector.broadcast %303 : vector<1x64xf32> to vector<4x64xf32>
    %318 = arith.mulf %316, %317 : vector<4x64xf32>
    %319 = arith.subf %315, %318 : vector<4x64xf32>
    %320 = vector.extract_strided_slice %1 {offsets = [0, 9], sizes = [4, 1], strides = [1, 1]} : vector<4x16xf32> to vector<4x1xf32>
    %321 = vector.extract_strided_slice %3 {offsets = [0, 9], sizes = [4, 1], strides = [1, 1]} : vector<4x16xf32> to vector<4x1xf32>
    %322 = vector.extract_strided_slice %5 {offsets = [0, 6], sizes = [4, 415], strides = [1, 1]} : vector<4x430xf32> to vector<4x415xf32>
    %323 = vector.extract_strided_slice %7 {offsets = [0, 6], sizes = [4, 415], strides = [1, 1]} : vector<4x430xf32> to vector<4x415xf32>
    %324 = vector.broadcast %320 : vector<4x1xf32> to vector<4x415xf32>
    %325 = arith.mulf %324, %322 : vector<4x415xf32>
    %326 = arith.addf %295, %325 : vector<4x415xf32>
    %327 = vector.broadcast %321 : vector<4x1xf32> to vector<4x415xf32>
    %328 = arith.mulf %327, %323 : vector<4x415xf32>
    %329 = arith.subf %326, %328 : vector<4x415xf32>
    %330 = vector.broadcast %320 : vector<4x1xf32> to vector<4x415xf32>
    %331 = arith.mulf %330, %323 : vector<4x415xf32>
    %332 = arith.addf %301, %331 : vector<4x415xf32>
    %333 = vector.broadcast %321 : vector<4x1xf32> to vector<4x415xf32>
    %334 = arith.mulf %333, %322 : vector<4x415xf32>
    %335 = arith.addf %332, %334 : vector<4x415xf32>
    %336 = vector.extract_strided_slice %8 {offsets = [9, 0], sizes = [1, 64], strides = [1, 1]} : vector<16x64xf32> to vector<1x64xf32>
    %337 = vector.extract_strided_slice %9 {offsets = [9, 0], sizes = [1, 64], strides = [1, 1]} : vector<16x64xf32> to vector<1x64xf32>
    %338 = vector.broadcast %320 : vector<4x1xf32> to vector<4x64xf32>
    %339 = vector.broadcast %336 : vector<1x64xf32> to vector<4x64xf32>
    %340 = arith.mulf %338, %339 : vector<4x64xf32>
    %341 = arith.addf %311, %340 : vector<4x64xf32>
    %342 = vector.broadcast %321 : vector<4x1xf32> to vector<4x64xf32>
    %343 = vector.broadcast %337 : vector<1x64xf32> to vector<4x64xf32>
    %344 = arith.mulf %342, %343 : vector<4x64xf32>
    %345 = arith.addf %341, %344 : vector<4x64xf32>
    %346 = vector.broadcast %321 : vector<4x1xf32> to vector<4x64xf32>
    %347 = vector.broadcast %336 : vector<1x64xf32> to vector<4x64xf32>
    %348 = arith.mulf %346, %347 : vector<4x64xf32>
    %349 = arith.addf %319, %348 : vector<4x64xf32>
    %350 = vector.broadcast %320 : vector<4x1xf32> to vector<4x64xf32>
    %351 = vector.broadcast %337 : vector<1x64xf32> to vector<4x64xf32>
    %352 = arith.mulf %350, %351 : vector<4x64xf32>
    %353 = arith.subf %349, %352 : vector<4x64xf32>
    %354 = vector.extract_strided_slice %1 {offsets = [0, 10], sizes = [4, 1], strides = [1, 1]} : vector<4x16xf32> to vector<4x1xf32>
    %355 = vector.extract_strided_slice %3 {offsets = [0, 10], sizes = [4, 1], strides = [1, 1]} : vector<4x16xf32> to vector<4x1xf32>
    %356 = vector.extract_strided_slice %5 {offsets = [0, 5], sizes = [4, 415], strides = [1, 1]} : vector<4x430xf32> to vector<4x415xf32>
    %357 = vector.extract_strided_slice %7 {offsets = [0, 5], sizes = [4, 415], strides = [1, 1]} : vector<4x430xf32> to vector<4x415xf32>
    %358 = vector.broadcast %354 : vector<4x1xf32> to vector<4x415xf32>
    %359 = arith.mulf %358, %356 : vector<4x415xf32>
    %360 = arith.addf %329, %359 : vector<4x415xf32>
    %361 = vector.broadcast %355 : vector<4x1xf32> to vector<4x415xf32>
    %362 = arith.mulf %361, %357 : vector<4x415xf32>
    %363 = arith.subf %360, %362 : vector<4x415xf32>
    %364 = vector.broadcast %354 : vector<4x1xf32> to vector<4x415xf32>
    %365 = arith.mulf %364, %357 : vector<4x415xf32>
    %366 = arith.addf %335, %365 : vector<4x415xf32>
    %367 = vector.broadcast %355 : vector<4x1xf32> to vector<4x415xf32>
    %368 = arith.mulf %367, %356 : vector<4x415xf32>
    %369 = arith.addf %366, %368 : vector<4x415xf32>
    %370 = vector.extract_strided_slice %8 {offsets = [10, 0], sizes = [1, 64], strides = [1, 1]} : vector<16x64xf32> to vector<1x64xf32>
    %371 = vector.extract_strided_slice %9 {offsets = [10, 0], sizes = [1, 64], strides = [1, 1]} : vector<16x64xf32> to vector<1x64xf32>
    %372 = vector.broadcast %354 : vector<4x1xf32> to vector<4x64xf32>
    %373 = vector.broadcast %370 : vector<1x64xf32> to vector<4x64xf32>
    %374 = arith.mulf %372, %373 : vector<4x64xf32>
    %375 = arith.addf %345, %374 : vector<4x64xf32>
    %376 = vector.broadcast %355 : vector<4x1xf32> to vector<4x64xf32>
    %377 = vector.broadcast %371 : vector<1x64xf32> to vector<4x64xf32>
    %378 = arith.mulf %376, %377 : vector<4x64xf32>
    %379 = arith.addf %375, %378 : vector<4x64xf32>
    %380 = vector.broadcast %355 : vector<4x1xf32> to vector<4x64xf32>
    %381 = vector.broadcast %370 : vector<1x64xf32> to vector<4x64xf32>
    %382 = arith.mulf %380, %381 : vector<4x64xf32>
    %383 = arith.addf %353, %382 : vector<4x64xf32>
    %384 = vector.broadcast %354 : vector<4x1xf32> to vector<4x64xf32>
    %385 = vector.broadcast %371 : vector<1x64xf32> to vector<4x64xf32>
    %386 = arith.mulf %384, %385 : vector<4x64xf32>
    %387 = arith.subf %383, %386 : vector<4x64xf32>
    %388 = vector.extract_strided_slice %1 {offsets = [0, 11], sizes = [4, 1], strides = [1, 1]} : vector<4x16xf32> to vector<4x1xf32>
    %389 = vector.extract_strided_slice %3 {offsets = [0, 11], sizes = [4, 1], strides = [1, 1]} : vector<4x16xf32> to vector<4x1xf32>
    %390 = vector.extract_strided_slice %5 {offsets = [0, 4], sizes = [4, 415], strides = [1, 1]} : vector<4x430xf32> to vector<4x415xf32>
    %391 = vector.extract_strided_slice %7 {offsets = [0, 4], sizes = [4, 415], strides = [1, 1]} : vector<4x430xf32> to vector<4x415xf32>
    %392 = vector.broadcast %388 : vector<4x1xf32> to vector<4x415xf32>
    %393 = arith.mulf %392, %390 : vector<4x415xf32>
    %394 = arith.addf %363, %393 : vector<4x415xf32>
    %395 = vector.broadcast %389 : vector<4x1xf32> to vector<4x415xf32>
    %396 = arith.mulf %395, %391 : vector<4x415xf32>
    %397 = arith.subf %394, %396 : vector<4x415xf32>
    %398 = vector.broadcast %388 : vector<4x1xf32> to vector<4x415xf32>
    %399 = arith.mulf %398, %391 : vector<4x415xf32>
    %400 = arith.addf %369, %399 : vector<4x415xf32>
    %401 = vector.broadcast %389 : vector<4x1xf32> to vector<4x415xf32>
    %402 = arith.mulf %401, %390 : vector<4x415xf32>
    %403 = arith.addf %400, %402 : vector<4x415xf32>
    %404 = vector.extract_strided_slice %8 {offsets = [11, 0], sizes = [1, 64], strides = [1, 1]} : vector<16x64xf32> to vector<1x64xf32>
    %405 = vector.extract_strided_slice %9 {offsets = [11, 0], sizes = [1, 64], strides = [1, 1]} : vector<16x64xf32> to vector<1x64xf32>
    %406 = vector.broadcast %388 : vector<4x1xf32> to vector<4x64xf32>
    %407 = vector.broadcast %404 : vector<1x64xf32> to vector<4x64xf32>
    %408 = arith.mulf %406, %407 : vector<4x64xf32>
    %409 = arith.addf %379, %408 : vector<4x64xf32>
    %410 = vector.broadcast %389 : vector<4x1xf32> to vector<4x64xf32>
    %411 = vector.broadcast %405 : vector<1x64xf32> to vector<4x64xf32>
    %412 = arith.mulf %410, %411 : vector<4x64xf32>
    %413 = arith.addf %409, %412 : vector<4x64xf32>
    %414 = vector.broadcast %389 : vector<4x1xf32> to vector<4x64xf32>
    %415 = vector.broadcast %404 : vector<1x64xf32> to vector<4x64xf32>
    %416 = arith.mulf %414, %415 : vector<4x64xf32>
    %417 = arith.addf %387, %416 : vector<4x64xf32>
    %418 = vector.broadcast %388 : vector<4x1xf32> to vector<4x64xf32>
    %419 = vector.broadcast %405 : vector<1x64xf32> to vector<4x64xf32>
    %420 = arith.mulf %418, %419 : vector<4x64xf32>
    %421 = arith.subf %417, %420 : vector<4x64xf32>
    %422 = vector.extract_strided_slice %1 {offsets = [0, 12], sizes = [4, 1], strides = [1, 1]} : vector<4x16xf32> to vector<4x1xf32>
    %423 = vector.extract_strided_slice %3 {offsets = [0, 12], sizes = [4, 1], strides = [1, 1]} : vector<4x16xf32> to vector<4x1xf32>
    %424 = vector.extract_strided_slice %5 {offsets = [0, 3], sizes = [4, 415], strides = [1, 1]} : vector<4x430xf32> to vector<4x415xf32>
    %425 = vector.extract_strided_slice %7 {offsets = [0, 3], sizes = [4, 415], strides = [1, 1]} : vector<4x430xf32> to vector<4x415xf32>
    %426 = vector.broadcast %422 : vector<4x1xf32> to vector<4x415xf32>
    %427 = arith.mulf %426, %424 : vector<4x415xf32>
    %428 = arith.addf %397, %427 : vector<4x415xf32>
    %429 = vector.broadcast %423 : vector<4x1xf32> to vector<4x415xf32>
    %430 = arith.mulf %429, %425 : vector<4x415xf32>
    %431 = arith.subf %428, %430 : vector<4x415xf32>
    %432 = vector.broadcast %422 : vector<4x1xf32> to vector<4x415xf32>
    %433 = arith.mulf %432, %425 : vector<4x415xf32>
    %434 = arith.addf %403, %433 : vector<4x415xf32>
    %435 = vector.broadcast %423 : vector<4x1xf32> to vector<4x415xf32>
    %436 = arith.mulf %435, %424 : vector<4x415xf32>
    %437 = arith.addf %434, %436 : vector<4x415xf32>
    %438 = vector.extract_strided_slice %8 {offsets = [12, 0], sizes = [1, 64], strides = [1, 1]} : vector<16x64xf32> to vector<1x64xf32>
    %439 = vector.extract_strided_slice %9 {offsets = [12, 0], sizes = [1, 64], strides = [1, 1]} : vector<16x64xf32> to vector<1x64xf32>
    %440 = vector.broadcast %422 : vector<4x1xf32> to vector<4x64xf32>
    %441 = vector.broadcast %438 : vector<1x64xf32> to vector<4x64xf32>
    %442 = arith.mulf %440, %441 : vector<4x64xf32>
    %443 = arith.addf %413, %442 : vector<4x64xf32>
    %444 = vector.broadcast %423 : vector<4x1xf32> to vector<4x64xf32>
    %445 = vector.broadcast %439 : vector<1x64xf32> to vector<4x64xf32>
    %446 = arith.mulf %444, %445 : vector<4x64xf32>
    %447 = arith.addf %443, %446 : vector<4x64xf32>
    %448 = vector.broadcast %423 : vector<4x1xf32> to vector<4x64xf32>
    %449 = vector.broadcast %438 : vector<1x64xf32> to vector<4x64xf32>
    %450 = arith.mulf %448, %449 : vector<4x64xf32>
    %451 = arith.addf %421, %450 : vector<4x64xf32>
    %452 = vector.broadcast %422 : vector<4x1xf32> to vector<4x64xf32>
    %453 = vector.broadcast %439 : vector<1x64xf32> to vector<4x64xf32>
    %454 = arith.mulf %452, %453 : vector<4x64xf32>
    %455 = arith.subf %451, %454 : vector<4x64xf32>
    %456 = vector.extract_strided_slice %1 {offsets = [0, 13], sizes = [4, 1], strides = [1, 1]} : vector<4x16xf32> to vector<4x1xf32>
    %457 = vector.extract_strided_slice %3 {offsets = [0, 13], sizes = [4, 1], strides = [1, 1]} : vector<4x16xf32> to vector<4x1xf32>
    %458 = vector.extract_strided_slice %5 {offsets = [0, 2], sizes = [4, 415], strides = [1, 1]} : vector<4x430xf32> to vector<4x415xf32>
    %459 = vector.extract_strided_slice %7 {offsets = [0, 2], sizes = [4, 415], strides = [1, 1]} : vector<4x430xf32> to vector<4x415xf32>
    %460 = vector.broadcast %456 : vector<4x1xf32> to vector<4x415xf32>
    %461 = arith.mulf %460, %458 : vector<4x415xf32>
    %462 = arith.addf %431, %461 : vector<4x415xf32>
    %463 = vector.broadcast %457 : vector<4x1xf32> to vector<4x415xf32>
    %464 = arith.mulf %463, %459 : vector<4x415xf32>
    %465 = arith.subf %462, %464 : vector<4x415xf32>
    %466 = vector.broadcast %456 : vector<4x1xf32> to vector<4x415xf32>
    %467 = arith.mulf %466, %459 : vector<4x415xf32>
    %468 = arith.addf %437, %467 : vector<4x415xf32>
    %469 = vector.broadcast %457 : vector<4x1xf32> to vector<4x415xf32>
    %470 = arith.mulf %469, %458 : vector<4x415xf32>
    %471 = arith.addf %468, %470 : vector<4x415xf32>
    %472 = vector.extract_strided_slice %8 {offsets = [13, 0], sizes = [1, 64], strides = [1, 1]} : vector<16x64xf32> to vector<1x64xf32>
    %473 = vector.extract_strided_slice %9 {offsets = [13, 0], sizes = [1, 64], strides = [1, 1]} : vector<16x64xf32> to vector<1x64xf32>
    %474 = vector.broadcast %456 : vector<4x1xf32> to vector<4x64xf32>
    %475 = vector.broadcast %472 : vector<1x64xf32> to vector<4x64xf32>
    %476 = arith.mulf %474, %475 : vector<4x64xf32>
    %477 = arith.addf %447, %476 : vector<4x64xf32>
    %478 = vector.broadcast %457 : vector<4x1xf32> to vector<4x64xf32>
    %479 = vector.broadcast %473 : vector<1x64xf32> to vector<4x64xf32>
    %480 = arith.mulf %478, %479 : vector<4x64xf32>
    %481 = arith.addf %477, %480 : vector<4x64xf32>
    %482 = vector.broadcast %457 : vector<4x1xf32> to vector<4x64xf32>
    %483 = vector.broadcast %472 : vector<1x64xf32> to vector<4x64xf32>
    %484 = arith.mulf %482, %483 : vector<4x64xf32>
    %485 = arith.addf %455, %484 : vector<4x64xf32>
    %486 = vector.broadcast %456 : vector<4x1xf32> to vector<4x64xf32>
    %487 = vector.broadcast %473 : vector<1x64xf32> to vector<4x64xf32>
    %488 = arith.mulf %486, %487 : vector<4x64xf32>
    %489 = arith.subf %485, %488 : vector<4x64xf32>
    %490 = vector.extract_strided_slice %1 {offsets = [0, 14], sizes = [4, 1], strides = [1, 1]} : vector<4x16xf32> to vector<4x1xf32>
    %491 = vector.extract_strided_slice %3 {offsets = [0, 14], sizes = [4, 1], strides = [1, 1]} : vector<4x16xf32> to vector<4x1xf32>
    %492 = vector.extract_strided_slice %5 {offsets = [0, 1], sizes = [4, 415], strides = [1, 1]} : vector<4x430xf32> to vector<4x415xf32>
    %493 = vector.extract_strided_slice %7 {offsets = [0, 1], sizes = [4, 415], strides = [1, 1]} : vector<4x430xf32> to vector<4x415xf32>
    %494 = vector.broadcast %490 : vector<4x1xf32> to vector<4x415xf32>
    %495 = arith.mulf %494, %492 : vector<4x415xf32>
    %496 = arith.addf %465, %495 : vector<4x415xf32>
    %497 = vector.broadcast %491 : vector<4x1xf32> to vector<4x415xf32>
    %498 = arith.mulf %497, %493 : vector<4x415xf32>
    %499 = arith.subf %496, %498 : vector<4x415xf32>
    %500 = vector.broadcast %490 : vector<4x1xf32> to vector<4x415xf32>
    %501 = arith.mulf %500, %493 : vector<4x415xf32>
    %502 = arith.addf %471, %501 : vector<4x415xf32>
    %503 = vector.broadcast %491 : vector<4x1xf32> to vector<4x415xf32>
    %504 = arith.mulf %503, %492 : vector<4x415xf32>
    %505 = arith.addf %502, %504 : vector<4x415xf32>
    %506 = vector.extract_strided_slice %8 {offsets = [14, 0], sizes = [1, 64], strides = [1, 1]} : vector<16x64xf32> to vector<1x64xf32>
    %507 = vector.extract_strided_slice %9 {offsets = [14, 0], sizes = [1, 64], strides = [1, 1]} : vector<16x64xf32> to vector<1x64xf32>
    %508 = vector.broadcast %490 : vector<4x1xf32> to vector<4x64xf32>
    %509 = vector.broadcast %506 : vector<1x64xf32> to vector<4x64xf32>
    %510 = arith.mulf %508, %509 : vector<4x64xf32>
    %511 = arith.addf %481, %510 : vector<4x64xf32>
    %512 = vector.broadcast %491 : vector<4x1xf32> to vector<4x64xf32>
    %513 = vector.broadcast %507 : vector<1x64xf32> to vector<4x64xf32>
    %514 = arith.mulf %512, %513 : vector<4x64xf32>
    %515 = arith.addf %511, %514 : vector<4x64xf32>
    %516 = vector.broadcast %491 : vector<4x1xf32> to vector<4x64xf32>
    %517 = vector.broadcast %506 : vector<1x64xf32> to vector<4x64xf32>
    %518 = arith.mulf %516, %517 : vector<4x64xf32>
    %519 = arith.addf %489, %518 : vector<4x64xf32>
    %520 = vector.broadcast %490 : vector<4x1xf32> to vector<4x64xf32>
    %521 = vector.broadcast %507 : vector<1x64xf32> to vector<4x64xf32>
    %522 = arith.mulf %520, %521 : vector<4x64xf32>
    %523 = arith.subf %519, %522 : vector<4x64xf32>
    %524 = vector.extract_strided_slice %1 {offsets = [0, 15], sizes = [4, 1], strides = [1, 1]} : vector<4x16xf32> to vector<4x1xf32>
    %525 = vector.extract_strided_slice %3 {offsets = [0, 15], sizes = [4, 1], strides = [1, 1]} : vector<4x16xf32> to vector<4x1xf32>
    %526 = vector.extract_strided_slice %5 {offsets = [0, 0], sizes = [4, 415], strides = [1, 1]} : vector<4x430xf32> to vector<4x415xf32>
    %527 = vector.extract_strided_slice %7 {offsets = [0, 0], sizes = [4, 415], strides = [1, 1]} : vector<4x430xf32> to vector<4x415xf32>
    %528 = vector.broadcast %524 : vector<4x1xf32> to vector<4x415xf32>
    %529 = arith.mulf %528, %526 : vector<4x415xf32>
    %530 = arith.addf %499, %529 : vector<4x415xf32>
    %531 = vector.broadcast %525 : vector<4x1xf32> to vector<4x415xf32>
    %532 = arith.mulf %531, %527 : vector<4x415xf32>
    %533 = arith.subf %530, %532 : vector<4x415xf32>
    %534 = vector.broadcast %524 : vector<4x1xf32> to vector<4x415xf32>
    %535 = arith.mulf %534, %527 : vector<4x415xf32>
    %536 = arith.addf %505, %535 : vector<4x415xf32>
    %537 = vector.broadcast %525 : vector<4x1xf32> to vector<4x415xf32>
    %538 = arith.mulf %537, %526 : vector<4x415xf32>
    %539 = arith.addf %536, %538 : vector<4x415xf32>
    %540 = vector.extract_strided_slice %8 {offsets = [15, 0], sizes = [1, 64], strides = [1, 1]} : vector<16x64xf32> to vector<1x64xf32>
    %541 = vector.extract_strided_slice %9 {offsets = [15, 0], sizes = [1, 64], strides = [1, 1]} : vector<16x64xf32> to vector<1x64xf32>
    %542 = vector.broadcast %524 : vector<4x1xf32> to vector<4x64xf32>
    %543 = vector.broadcast %540 : vector<1x64xf32> to vector<4x64xf32>
    %544 = arith.mulf %542, %543 : vector<4x64xf32>
    %545 = arith.addf %515, %544 : vector<4x64xf32>
    %546 = vector.broadcast %525 : vector<4x1xf32> to vector<4x64xf32>
    %547 = vector.broadcast %541 : vector<1x64xf32> to vector<4x64xf32>
    %548 = arith.mulf %546, %547 : vector<4x64xf32>
    %549 = arith.addf %545, %548 : vector<4x64xf32>
    %550 = vector.broadcast %525 : vector<4x1xf32> to vector<4x64xf32>
    %551 = vector.broadcast %540 : vector<1x64xf32> to vector<4x64xf32>
    %552 = arith.mulf %550, %551 : vector<4x64xf32>
    %553 = arith.addf %523, %552 : vector<4x64xf32>
    %554 = vector.broadcast %524 : vector<4x1xf32> to vector<4x64xf32>
    %555 = vector.broadcast %541 : vector<1x64xf32> to vector<4x64xf32>
    %556 = arith.mulf %554, %555 : vector<4x64xf32>
    %557 = arith.subf %553, %556 : vector<4x64xf32>
    %c0_17 = arith.constant 0 : index
    %c0_18 = arith.constant 0 : index
    %c0_19 = arith.constant 0 : index
    %558 = vector.load %arg5[%c0_17, %c0_18, %c0_19] : memref<2x4x415xf32, #tpu.memory_space<vmem>>, vector<1x4x415xf32>
    %559 = vector.shape_cast %558 : vector<1x4x415xf32> to vector<4x415xf32>
    %560 = vector.shape_cast %533 : vector<4x415xf32> to vector<1x4x415xf32>
    tpu.vector_store %arg5[%c0_17, %c0_18, %c0_19], %560 {strides = array<i32>} : memref<2x4x415xf32, #tpu.memory_space<vmem>>, vector<1x4x415xf32>,
    %c1_20 = arith.constant 1 : index
    %c0_21 = arith.constant 0 : index
    %c0_22 = arith.constant 0 : index
    %561 = vector.load %arg5[%c1_20, %c0_21, %c0_22] : memref<2x4x415xf32, #tpu.memory_space<vmem>>, vector<1x4x415xf32>
    %562 = vector.shape_cast %561 : vector<1x4x415xf32> to vector<4x415xf32>
    %563 = vector.shape_cast %539 : vector<4x415xf32> to vector<1x4x415xf32>
    tpu.vector_store %arg5[%c1_20, %c0_21, %c0_22], %563 {strides = array<i32>} : memref<2x4x415xf32, #tpu.memory_space<vmem>>, vector<1x4x415xf32>,
    %c0_23 = arith.constant 0 : index
    %c0_24 = arith.constant 0 : index
    %c0_25 = arith.constant 0 : index
    %564 = vector.load %arg6[%c0_23, %c0_24, %c0_25] : memref<2x4x64xf32, #tpu.memory_space<vmem>>, vector<1x4x64xf32>
    %565 = vector.shape_cast %564 : vector<1x4x64xf32> to vector<4x64xf32>
    %566 = vector.shape_cast %549 : vector<4x64xf32> to vector<1x4x64xf32>
    tpu.vector_store %arg6[%c0_23, %c0_24, %c0_25], %566 {strides = array<i32>} : memref<2x4x64xf32, #tpu.memory_space<vmem>>, vector<1x4x64xf32>,
    %c1_26 = arith.constant 1 : index
    %c0_27 = arith.constant 0 : index
    %c0_28 = arith.constant 0 : index
    %567 = vector.load %arg6[%c1_26, %c0_27, %c0_28] : memref<2x4x64xf32, #tpu.memory_space<vmem>>, vector<1x4x64xf32>
    %568 = vector.shape_cast %567 : vector<1x4x64xf32> to vector<4x64xf32>
    %569 = vector.shape_cast %557 : vector<4x64xf32> to vector<1x4x64xf32>
    tpu.vector_store %arg6[%c1_26, %c0_27, %c0_28], %569 {strides = array<i32>} : memref<2x4x64xf32, #tpu.memory_space<vmem>>, vector<1x4x64xf32>,
    return
  }
  func.func @transform_0(%arg0: i32) -> (i32, i32, i32) {
    %c0_i32 = arith.constant 0 : i32
    %c0_i32_0 = arith.constant 0 : i32
    %c0_i32_1 = arith.constant 0 : i32
    %c0_i32_2 = arith.constant 0 : i32
    return %c0_i32, %c0_i32_0, %c0_i32_1 : i32, i32, i32
  }
  func.func @transform_1(%arg0: i32) -> (i32, i32, i32) {
    %c0_i32 = arith.constant 0 : i32
    %c0_i32_0 = arith.constant 0 : i32
    %c0_i32_1 = arith.constant 0 : i32
    %c0_i32_2 = arith.constant 0 : i32
    return %c0_i32, %c0_i32_0, %c0_i32_1 : i32, i32, i32
  }
  func.func @transform_2(%arg0: i32) -> (i32, i32) {
    %c0_i32 = arith.constant 0 : i32
    %c0_i32_0 = arith.constant 0 : i32
    %c0_i32_1 = arith.constant 0 : i32
    return %c0_i32, %c0_i32_0 : i32, i32
  }
  func.func @transform_3(%arg0: i32) -> (i32, i32) {
    %c0_i32 = arith.constant 0 : i32
    %c0_i32_0 = arith.constant 0 : i32
    %c0_i32_1 = arith.constant 0 : i32
    return %c0_i32, %c0_i32_0 : i32, i32
  }
  func.func @transform_4(%arg0: i32) -> (i32, i32, i32) {
    %c0_i32 = arith.constant 0 : i32
    %c0_i32_0 = arith.constant 0 : i32
    %c0_i32_1 = arith.constant 0 : i32
    %c0_i32_2 = arith.constant 0 : i32
    return %c0_i32, %c0_i32_0, %c0_i32_1 : i32, i32, i32
  }
  func.func @transform_5(%arg0: i32) -> (i32, i32, i32) {
    %c0_i32 = arith.constant 0 : i32
    %c0_i32_0 = arith.constant 0 : i32
    %c0_i32_1 = arith.constant 0 : i32
    %c0_i32_2 = arith.constant 0 : i32
    return %c0_i32, %c0_i32_0, %c0_i32_1 : i32, i32, i32
  }
}

</mosaic_0001>

<bundles_post_ra>
// kernel: tpu_custom_call.1
= control target key start
LH: loop header
LB: loop body
LE: loop exit
PB: predicated region body
PF: predicated region fallthrough
CT: control target
= control target key end

     0   :  { %11 = vsyncpa [#allocation3], 0  ;;  %s3403_s0 = inlined_call_operand.hbm [shape: f32[2,4,16], index: 0, kind: input, shape index: {}]   ;;  %s3404_s1 = inlined_call_operand.hbm [shape: f32[2,4,430], index: 1, kind: input, shape index: {}]   ;;  %s3405_s2 = inlined_call_operand.hbm [shape: f32[16,64], index: 2, kind: input, shape index: {}]   ;;  %s3406_s3 = inlined_call_operand.hbm [shape: f32[16,64], index: 3, kind: input, shape index: {}]   ;;  %s3407_s4 = inlined_call_operand.hbm [shape: f32[2,4,415], index: 4, kind: output, shape index: {0}]   ;;  %s3408_s5 = inlined_call_operand.hbm [shape: f32[2,4,64], index: 5, kind: output, shape index: {1}]  }
   0x1   :  { %12 = vsyncpa [#allocation6], 0 }
   0x2   :  { %13 = vsyncpa [#allocation9], 0 }
   0x3   :  { %14 = vsyncpa [#allocation4], 0 }
   0x4   :  { %15 = vsyncpa [#allocation12], 0  ;;  %s1750_s18 = smov [#allocation5]   ;;  %s1608_s22 = scalar_lea.hbm %s3404_s1, 512 }
   0x5   :  { %s33_s19 = sshll.u32 %s1750_s18, 4  ;;  %p1609_p0 = scmp.ne.s32.totalorder %s3404_s1, %s1608_s22  ;;  %s34_s19 = int_to_ptr.vmem [resolvable:$true] %s33_s19 }
   0x6   :  { %p1612_p1 = scmp.lt.u32.totalorder %s1608_s22, %s3404_s1 }
   0x8   :  { %p1614_p2 = pnand %p1612_p1, %p1609_p0 }
   0xa   :  { %1617 = shalt.err (!%p1614_p2)
}
   0xb   :  { %s1618_s27 = scalar_lea.vmem %s34_s19, 512  ;;  %p1623_p4 = scmp.lt.s32.totalorder %s34_s19, %s34_s19 }
   0xc   :  { %p1619_p3 = scmp.ne.s32.totalorder %s34_s19, %s1618_s27  ;;  %p1624_p5 = scmp.lt.s32.totalorder %s1618_s27, %s1618_s27 }
   0xe   :  { %p1625_p6 = por %p1624_p5, %p1623_p4 }
  0x10   :  { %p1626_p7 = pnand %p1625_p6, %p1619_p3 }
  0x12   :  { %1629 = shalt.err (!%p1626_p7)
}
  0x13   :  { %s1751_s28 = smov 256   ;;  %s1752_s29 = smov 16  }
  0x14   :  { %39 = dma.hbm_to_vmem [thread:$0]  %s3404_s1, 512, %s34_s19, [#allocation6], %s1751_s28, %s1751_s28, %s1752_s29  }
  0x15   :  { %s1753_s7 = smov [#allocation2]   ;;  %s1630_s11 = scalar_lea.hbm %s3403_s0, 128 }
  0x16   :  { %s21_s8 = sshll.u32 %s1753_s7, 4  ;;  %p1631_p8 = scmp.ne.s32.totalorder %s3403_s0, %s1630_s11  ;;  %s22_s8 = int_to_ptr.vmem [resolvable:$true] %s21_s8 }
  0x17   :  { %p1634_p9 = scmp.lt.u32.totalorder %s1630_s11, %s3403_s0 }
  0x19   :  { %p1636_p10 = pnand %p1634_p9, %p1631_p8 }
  0x1b   :  { %1639 = shalt.err (!%p1636_p10)
}
  0x1c   :  { %s1640_s16 = scalar_lea.vmem %s22_s8, 128  ;;  %p1645_p12 = scmp.lt.s32.totalorder %s22_s8, %s22_s8 }
  0x1d   :  { %p1641_p11 = scmp.ne.s32.totalorder %s22_s8, %s1640_s16  ;;  %p1646_p13 = scmp.lt.s32.totalorder %s1640_s16, %s1640_s16 }
  0x1f   :  { %p1647_p0 = por %p1646_p13, %p1645_p12 }
  0x21   :  { %p1648_p1 = pnand %p1647_p0, %p1641_p11 }
  0x23   :  { %1651 = shalt.err (!%p1648_p1)
}
  0x24   :  { %s1754_s1 = smov 64   ;;  %s1755_s17 = smov 4  }
  0x25   :  { %27 = dma.hbm_to_vmem [thread:$0]  %s3403_s0, 128, %s22_s8, [#allocation3], %s1754_s1, %s1754_s1, %s1755_s17  }
  0x26   :  { %s1756_s20 = smov [#allocation7]   ;;  %s1652_s24 = scalar_lea.hbm %s3405_s2, 256 }
  0x27   :  { %s45_s21 = sshll.u32 %s1756_s20, 4  ;;  %p1653_p2 = scmp.ne.s32.totalorder %s3405_s2, %s1652_s24  ;;  %s46_s21 = int_to_ptr.vmem [resolvable:$true] %s45_s21 }
  0x28   :  { %p1656_p3 = scmp.lt.u32.totalorder %s1652_s24, %s3405_s2 }
  0x2a   :  { %p1658_p4 = pnand %p1656_p3, %p1653_p2 }
  0x2c   :  { %1661 = shalt.err (!%p1658_p4)
}
  0x2d   :  { %s1662_s6 = scalar_lea.vmem %s46_s21, 256  ;;  %p1667_p6 = scmp.lt.s32.totalorder %s46_s21, %s46_s21 }
  0x2e   :  { %p1663_p5 = scmp.ne.s32.totalorder %s46_s21, %s1662_s6  ;;  %p1668_p7 = scmp.lt.s32.totalorder %s1662_s6, %s1662_s6 }
  0x30   :  { %p1669_p8 = por %p1668_p7, %p1667_p6 }
  0x32   :  { %p1670_p9 = pnand %p1669_p8, %p1663_p5 }
  0x34   :  { %1673 = shalt.err (!%p1670_p9)
}
  0x35   :  { %s1757_s0 = smov 128   ;;  %s1758_s7 = smov 8  }
  0x36   :  { %51 = dma.hbm_to_vmem [thread:$0]  %s3405_s2, 256, %s46_s21, [#allocation6], %s1757_s0, %s1757_s0, %s1758_s7  }
  0x37   :  { %s1759_s10 = smov [#allocation8]   ;;  %s1674_s14 = scalar_lea.hbm %s3406_s3, 256 }
  0x38   :  { %s57_s11 = sshll.u32 %s1759_s10, 4  ;;  %p1675_p10 = scmp.ne.s32.totalorder %s3406_s3, %s1674_s14  ;;  %s58_s11 = int_to_ptr.vmem [resolvable:$true] %s57_s11 }
  0x39   :  { %p1678_p11 = scmp.lt.u32.totalorder %s1674_s14, %s3406_s3 }
  0x3b   :  { %p1680_p12 = pnand %p1678_p11, %p1675_p10 }
  0x3d   :  { %1683 = shalt.err (!%p1680_p12)
}
  0x3e   :  { %s1684_s20 = scalar_lea.vmem %s58_s11, 256  ;;  %p1689_p0 = scmp.lt.s32.totalorder %s58_s11, %s58_s11 }
  0x3f   :  { %p1685_p13 = scmp.ne.s32.totalorder %s58_s11, %s1684_s20  ;;  %p1690_p1 = scmp.lt.s32.totalorder %s1684_s20, %s1684_s20 }
  0x41   :  { %p1691_p2 = por %p1690_p1, %p1689_p0 }
  0x43   :  { %p1692_p3 = pnand %p1691_p2, %p1685_p13 }
  0x45   :  { %1695 = shalt.err (!%p1692_p3)
}
  0x46   :  { %63 = dma.hbm_to_vmem [thread:$0]  %s3406_s3, 256, %s58_s11, [#allocation9], %s1757_s0, %s1757_s0, %s1758_s7  }
  0x47   :  { %1740 = dma.done.wait [#allocation3], 128  }
  0x48   :  { %1741 = vsyncadd [#allocation3], 4294967168 }
  0x49   :  { %1742 = dma.done.wait [#allocation6], 768  }
  0x4a   :  { %1743 = vsyncadd [#allocation6], 4294966528 }
  0x4b   :  { %1744 = dma.done.wait [#allocation9], 256  }
  0x4c   :  { %1745 = vsyncadd [#allocation9], 4294967040  ;;  %v1760_v0 = vmov 0   ;;  %v1877_v1 = vld [vmem:[#allocation5 + $0x8] sm:$0xff]  ;;  %v1879_v2 = vld [vmem:[#allocation2] sm:$0xf]  ;;  %v169_v40 = vlaneseq }
  0x4d   :  { %1569 = vset.pattern.permute.xlu0 %v1760_v0  ;;  %1570 = vset.pattern.permute.xlu1 %v1760_v0  ;;  %s1761_s22 = smov 113   ;;  %v1883_v3 = vld [vmem:[#allocation2 + $0x4] sm:$0xf]  ;;  %v1885_v4 = vld [vmem:[#allocation5] sm:$0xff]  ;;  %v1895_v6 = vcombine.high %v1877_v1, %v1877_v1  ;;  %v1897_v7 = vld [vmem:[#allocation5 + $0x10] sm:$0xff]  ;;  %v1762_v8 = vmov 1  }
  0x4e   :  { %101 = vrot.lane.b32.xlu1 %v1877_v1, %s1761_s22  ;;  %90 = vperm.xlu0 %1569, %v1879_v2   ;;  %v1891_v5 = vcombine.high %v1885_v4, %v1885_v4  ;;  %v1903_v9 = vcombine.high %v1897_v7, %v1897_v7  ;;  %v1905_v10 = vld [vmem:[#allocation5 + $0x18] sm:$0xff]  ;;  %v1763_v11 = vmov 2   ;;  %s1764_s3 = smov 114   ;;  %s1765_s23 = smov 115   ;;  %v1766_v13 = vmov 4   ;;  %v2066_v47 = vld [vmem:[#allocation7] sm:$0xff] }
  0x4f   :  { %v1911_v12 = vcombine.high %v1905_v10, %v1905_v10  ;;  %v1767_v14 = vmov 3   ;;  %s1768_s24 = smov 116   ;;  %s1769_s25 = smov 117   ;;  %v1770_v15 = vmov 5   ;;  %v1771_v16 = vmov 6   ;;  %3439 = vst [vmem:[#allocation21_spill] sm:$0xff] %v2066_v47 }
  0x50   :  { %3436 = vst [vmem:[#allocation18_spill] sm:$0xff] %v1903_v9  ;;  %s1772_s26 = smov 118   ;;  %s1773_s27 = smov 119   ;;  %v1774_v17 = vmov 7   ;;  %v1776_v22 = vmov 8   ;;  %v1778_v37 = vmov 9  }
  0x51   :  { %s1775_s30 = smov 120   ;;  %s1777_s6 = smov 121   ;;  %v2053_v43 = vshrl.u32 %v169_v40, 7  ;;  %v2068_v48 = vld [vmem:[#allocation8] sm:$0xff]  ;;  %v1780_v56 = vmov 10   ;;  %vm105_vm0 = vcmask 924672  }
  0x52   :  { %123 = vperm.xlu1 %1570, %v1883_v3   ;;  %97 = vrot.lane.b32.xlu0 %v1885_v4, %s1761_s22  ;;  %s1779_s0 = smov 122   ;;  %3440 = vst [vmem:[#allocation22_spill] sm:$0xff] %v2068_v48  ;;  %vm197_vm1 = vcmask 932864   ;;  %s1781_s7 = smov 123   ;;  %vm284_vm2 = vcmask 941056   ;;  %vm371_vm3 = vcmask 949248  }
  0x53   :  { %1571 = vset.pattern.permute.xlu0 %v1762_v8  ;;  %3437 = vst [vmem:[#allocation19_spill] sm:$0xff] %v2053_v43  ;;  %v2063_v46 = vsub.s32 0, %v2053_v43  ;;  %v2075_v51 = vsub.s32 1, %v2053_v43  ;;  %v2084_v54 = vsub.s32 2, %v2053_v43  ;;  %v2089_v55 = vsub.s32 3, %v2053_v43  ;;  %s1783_s8 = smov 124  }
  0x54   :  { %v2096_v59 = vsub.s32 4, %v2053_v43  ;;  %v2099_v60 = vsub.s32 5, %v2053_v43  ;;  %vm458_vm4 = vcmask 957440   ;;  %s1786_s9 = smov 125   ;;  %vm545_vm5 = vcmask 965632   ;;  %s1787_s10 = smov 126  }
  0x55   :  { %3438 = vst [vmem:[#allocation20_spill] sm:$0xff] %v2063_v46  ;;  %3441 = vst [vmem:[#allocation23_spill] sm:$0xff] %v2075_v51  ;;  %v172_v52 = vrot.slane %v2066_v47, %v2063_v46  ;;  %v178_v53 = vrot.slane %v2068_v48, %v2063_v46  ;;  %v2103_v61 = vrot.slane %v2066_v47, %v2075_v51  ;;  %vm632_vm6 = vcmask 973824   ;;  %s1789_s11 = smov 127   ;;  %s1791_s12 = smov [#allocation10]  }
  0x56   :  { %99 = vrot.lane.b32.xlu1 %v1891_v5, %s1761_s22  ;;  %103 = vrot.lane.b32.xlu0 %v1895_v6, %s1761_s22  ;;  %3442 = vst [vmem:[#allocation24_spill] sm:$0xff] %v2084_v54  ;;  %3443 = vst [vmem:[#allocation25_spill] sm:$0xff] %v2089_v55  ;;  %v2107_v62 = vrot.slane %v2068_v48, %v2075_v51  ;;  %v2115_v8 = vrot.slane %v2066_v47, %v2084_v54  ;;  %vm719_vm7 = vcmask 982016   ;;  %vm806_vm8 = vcmask 990208   ;;  %s1496_s13 = sshll.u32 %s1791_s12, 4  ;;  %s1792_s14 = smov [#allocation11]   ;;  %s1497_s13 = int_to_ptr.vmem [resolvable:$true] %s1496_s13 }
  0x57   :  { %1572 = vset.pattern.permute.xlu1 %v1763_v11  ;;  %3444 = vst [vmem:[#allocation26_spill] sm:$0xff] %v2096_v59  ;;  %3445 = vst [vmem:[#allocation27_spill] sm:$0xff] %v2099_v60  ;;  %v2147_v40 = vrot.slane %v2068_v48, %v2096_v59  ;;  %vm893_vm9 = vcmask 998400   ;;  %vm980_vm10 = vcmask 1006592   ;;  %vm1067_vm11 = vcmask 1014784   ;;  %s1508_s15 = sshll.u32 %s1792_s14, 4  ;;  %p1701_p5 = scmp.lt.s32.totalorder %s1497_s13, %s1497_s13  ;;  %s3365_s15 = int_to_ptr.vmem [resolvable:$true] %s1508_s15 }
  0x58   :  { %vm1154_vm12 = vcmask 1022976   ;;  %vm1241_vm13 = vcmask 1031168   ;;  %vm1328_vm14 = vcmask 1039360   ;;  %vm1472_vm15 = vcmask 1043456   ;;  %s1696_s16 = scalar_lea.vmem %s1497_s13, 512 }
  0x59   :  { %3448 = vst [vmem:[#allocation30_spill] sm:$0xff] %v2147_v40  ;;  %p1697_p4 = scmp.ne.s32.totalorder %s1497_s13, %s1696_s16  ;;  %p1702_p6 = scmp.lt.s32.totalorder %s1696_s16, %s1696_s16 }
  0x5a   :  { %132 = vrot.lane.b32.xlu1 %v1903_v9, %s1761_s22  ;;  %130 = vrot.lane.b32.xlu0 %v1897_v7, %s1761_s22 }
  0x5b   :  { %p1703_p7 = por %p1702_p6, %p1701_p5 }
  0x5d   :  { %p1704_p8 = pnand %p1703_p7, %p1697_p4 }
  0x5e   :  { %136 = vrot.lane.b32.xlu1 %v1911_v12, %s1761_s22  ;;  %134 = vrot.lane.b32.xlu0 %v1905_v10, %s1761_s22 }
  0x62   :  { %189 = vrot.lane.b32.xlu1 %v1885_v4, %s1764_s3  ;;  %186 = vperm.xlu0 %1571, %v1879_v2  }
  0x66   :  { %191 = vrot.lane.b32.xlu1 %v1891_v5, %s1764_s3  ;;  %193 = vrot.lane.b32.xlu0 %v1877_v1, %s1764_s3 }
  0x6a   :  { %195 = vrot.lane.b32.xlu1 %v1895_v6, %s1764_s3  ;;  %214 = vperm.xlu0 %1571, %v1883_v3  }
  0x6e   :  { %217 = vrot.lane.b32.xlu1 %v1897_v7, %s1764_s3  ;;  %219 = vrot.lane.b32.xlu0 %v1903_v9, %s1764_s3 }
  0x6f   :  { %1573 = vset.pattern.permute.xlu0 %v1763_v11  ;;  %v2119_v11 = vrot.slane %v2068_v48, %v2084_v54 }
  0x72   :  { %221 = vrot.lane.b32.xlu1 %v1905_v10, %s1764_s3  ;;  %223 = vrot.lane.b32.xlu0 %v1911_v12, %s1764_s3 }
  0x76   :  { %273 = vperm.xlu1 %1572, %v1879_v2   ;;  %276 = vrot.lane.b32.xlu0 %v1885_v4, %s1765_s23 }
  0x7a   :  { %278 = vrot.lane.b32.xlu1 %v1891_v5, %s1765_s23  ;;  %280 = vrot.lane.b32.xlu0 %v1877_v1, %s1765_s23 }
  0x7b   :  { %1575 = vset.pattern.permute.xlu1 %v1766_v13 }
  0x7e   :  { %282 = vrot.lane.b32.xlu1 %v1895_v6, %s1765_s23  ;;  %301 = vperm.xlu0 %1573, %v1883_v3  }
  0x82   :  { %304 = vrot.lane.b32.xlu1 %v1897_v7, %s1765_s23  ;;  %308 = vrot.lane.b32.xlu0 %v1905_v10, %s1765_s23 }
  0x83   :  { %1574 = vset.pattern.permute.xlu0 %v1767_v14 }
  0x86   :  { %306 = vrot.lane.b32.xlu1 %v1903_v9, %s1765_s23  ;;  %360 = vperm.xlu0 %1574, %v1879_v2  }
  0x8a   :  { %310 = vrot.lane.b32.xlu1 %v1911_v12, %s1765_s23  ;;  %367 = vrot.lane.b32.xlu0 %v1877_v1, %s1768_s24 }
  0x8e   :  { %363 = vrot.lane.b32.xlu1 %v1885_v4, %s1768_s24  ;;  %388 = vperm.xlu0 %1574, %v1883_v3  }
  0x92   :  { %365 = vrot.lane.b32.xlu1 %v1891_v5, %s1768_s24  ;;  %393 = vrot.lane.b32.xlu0 %v1903_v9, %s1768_s24 }
  0x93   :  { %1576 = vset.pattern.permute.xlu0 %v1766_v13 }
  0x96   :  { %369 = vrot.lane.b32.xlu1 %v1895_v6, %s1768_s24  ;;  %397 = vrot.lane.b32.xlu0 %v1911_v12, %s1768_s24 }
  0x9a   :  { %391 = vrot.lane.b32.xlu1 %v1897_v7, %s1768_s24  ;;  %450 = vrot.lane.b32.xlu0 %v1885_v4, %s1769_s25 }
  0x9e   :  { %395 = vrot.lane.b32.xlu1 %v1905_v10, %s1768_s24  ;;  %454 = vrot.lane.b32.xlu0 %v1877_v1, %s1769_s25 }
  0xa2   :  { %447 = vperm.xlu1 %1575, %v1879_v2   ;;  %475 = vperm.xlu0 %1576, %v1883_v3  }
  0xa6   :  { %452 = vrot.lane.b32.xlu1 %v1891_v5, %s1769_s25  ;;  %482 = vrot.lane.b32.xlu0 %v1905_v10, %s1769_s25 }
  0xa7   :  { %1577 = vset.pattern.permute.xlu0 %v1770_v15  ;;  %1578 = vset.pattern.permute.xlu1 %v1771_v16  ;;  %v2131_v15 = vrot.slane %v2066_v47, %v2089_v55 }
  0xaa   :  { %456 = vrot.lane.b32.xlu1 %v1895_v6, %s1769_s25  ;;  %534 = vperm.xlu0 %1577, %v1879_v2  }
  0xae   :  { %478 = vrot.lane.b32.xlu1 %v1897_v7, %s1769_s25  ;;  %541 = vrot.lane.b32.xlu0 %v1877_v1, %s1772_s26 }
  0xb2   :  { %480 = vrot.lane.b32.xlu1 %v1903_v9, %s1769_s25  ;;  %562 = vperm.xlu0 %1577, %v1883_v3  }
  0xb6   :  { %484 = vrot.lane.b32.xlu1 %v1911_v12, %s1769_s25  ;;  %567 = vrot.lane.b32.xlu0 %v1903_v9, %s1772_s26 }
  0xb7   :  { %1579 = vset.pattern.permute.xlu0 %v1771_v16  ;;  %v2135_v16 = vrot.slane %v2068_v48, %v2089_v55  ;;  %v2163_v55 = vrot.slane %v2068_v48, %v2099_v60 }
  0xb9   :  { %3446 = vst [vmem:[#allocation28_spill] sm:$0xff] %v2135_v16  ;;  %3450 = vst [vmem:[#allocation32_spill] sm:$0xff] %v2163_v55 }
  0xba   :  { %537 = vrot.lane.b32.xlu1 %v1885_v4, %s1772_s26  ;;  %571 = vrot.lane.b32.xlu0 %v1911_v12, %s1772_s26 }
  0xbe   :  { %539 = vrot.lane.b32.xlu1 %v1891_v5, %s1772_s26  ;;  %624 = vrot.lane.b32.xlu0 %v1885_v4, %s1773_s27 }
  0xc0   :  { %v1972_v18 = vpop.permute.xlu1 %101 }
  0xc2   :  { %543 = vrot.lane.b32.xlu1 %v1895_v6, %s1772_s26  ;;  %628 = vrot.lane.b32.xlu0 %v1877_v1, %s1773_s27 }
  0xc6   :  { %565 = vrot.lane.b32.xlu1 %v1897_v7, %s1772_s26  ;;  %649 = vperm.xlu0 %1579, %v1883_v3  }
  0xca   :  { %569 = vrot.lane.b32.xlu1 %v1905_v10, %s1772_s26  ;;  %656 = vrot.lane.b32.xlu0 %v1905_v10, %s1773_s27 }
  0xcb   :  { %1580 = vset.pattern.permute.xlu0 %v1774_v17 }
  0xcd   :  { %v1974_v19 = vpop.permute.xlu0 %90 }
  0xce   :  { %621 = vperm.xlu1 %1578, %v1879_v2   ;;  %708 = vperm.xlu0 %1580, %v1879_v2   ;;  %v173_v63 = vmul.f32 %v172_v52, %v1974_v19  ;;  %v2124_v13 = vmul.f32 %v178_v53, %v1974_v19 }
  0xd1   :  { %v1978_v20 = vpop.permute.xlu1 %123  ;;  %v1980_v21 = vpop.permute.xlu0 %97 }
  0xd2   :  { %626 = vrot.lane.b32.xlu1 %v1891_v5, %s1773_s27  ;;  %715 = vrot.lane.b32.xlu0 %v1877_v1, %s1775_s30  ;;  %v179_v0 = vmul.f32 %v178_v53, %v1978_v20  ;;  %v2127_v14 = vmul.f32 %v172_v52, %v1978_v20  ;;  %v2151_v52 = vrot.slane %v2066_v47, %v2099_v60 }
  0xd3   :  { %1581 = vset.pattern.permute.xlu1 %v1776_v22 }
  0xd4   :  { %3449 = vst [vmem:[#allocation31_spill] sm:$0xff] %v2151_v52 }
  0xd5   :  { %v1986_v23 = vpop.permute.xlu1 %99  ;;  %v1988_v24 = vpop.permute.xlu0 %103 }
  0xd6   :  { %630 = vrot.lane.b32.xlu1 %v1895_v6, %s1773_s27  ;;  %736 = vperm.xlu0 %1580, %v1883_v3   ;;  %v106_v53 = vsel %vm105_vm0, %v1980_v21, %v1986_v23  ;;  %v107_v54 = vsel %vm105_vm0, %v1986_v23, %v1972_v18  ;;  %v108_v60 = vsel %vm105_vm0, %v1972_v18, %v1988_v24 }
  0xd7   :  { %v114_v46 = vmul.f32 %v107_v54, %v1974_v19  ;;  %v161_v48 = vmul.f32 %v1978_v20, %v106_v53  ;;  %v163_v52 = vmul.f32 %v1978_v20, %v108_v60  ;;  %v164_v40 = vmul.f32 %v1978_v20, %v1988_v24 }
  0xd9   :  { %v1993_v25 = vpop.permute.xlu1 %132  ;;  %v1995_v26 = vpop.permute.xlu0 %130 }
  0xda   :  { %652 = vrot.lane.b32.xlu1 %v1897_v7, %s1773_s27  ;;  %741 = vrot.lane.b32.xlu0 %v1903_v9, %s1775_s30 }
  0xdb   :  { %1582 = vset.pattern.permute.xlu0 %v1776_v22 }
  0xdd   :  { %v2001_v27 = vpop.permute.xlu1 %136  ;;  %v2003_v28 = vpop.permute.xlu0 %134 }
  0xde   :  { %654 = vrot.lane.b32.xlu1 %v1903_v9, %s1773_s27  ;;  %745 = vrot.lane.b32.xlu0 %v1911_v12, %s1775_s30  ;;  %v139_v21 = vsel %vm105_vm0, %v1993_v25, %v2003_v28  ;;  %v140_v23 = vsel %vm105_vm0, %v2003_v28, %v2001_v27  ;;  %v156_v28 = vmul.f32 %v2001_v27, %v1974_v19 }
  0xdf   :  { %v154_v43 = vmul.f32 %v139_v21, %v1974_v19 }
  0xe1   :  { %v2009_v29 = vpop.permute.xlu1 %189  ;;  %v2011_v30 = vpop.permute.xlu0 %186 }
  0xe2   :  { %658 = vrot.lane.b32.xlu1 %v1911_v12, %s1773_s27  ;;  %798 = vrot.lane.b32.xlu0 %v1885_v4, %s1777_s6 }
  0xe5   :  { %v2017_v31 = vpop.permute.xlu1 %191  ;;  %v2019_v32 = vpop.permute.xlu0 %193 }
  0xe6   :  { %711 = vrot.lane.b32.xlu1 %v1885_v4, %s1775_s30  ;;  %802 = vrot.lane.b32.xlu0 %v1877_v1, %s1777_s6  ;;  %v198_v55 = vsel %vm197_vm1, %v2009_v29, %v2017_v31 }
  0xe9   :  { %v2025_v33 = vpop.permute.xlu1 %195  ;;  %v2027_v34 = vpop.permute.xlu0 %214 }
  0xea   :  { %713 = vrot.lane.b32.xlu1 %v1891_v5, %s1775_s30  ;;  %823 = vperm.xlu0 %1582, %v1883_v3  }
  0xed   :  { %v2032_v35 = vpop.permute.xlu1 %217  ;;  %v2034_v36 = vpop.permute.xlu0 %219 }
  0xee   :  { %717 = vrot.lane.b32.xlu1 %v1895_v6, %s1775_s30  ;;  %830 = vrot.lane.b32.xlu0 %v1905_v10, %s1777_s6 }
  0xef   :  { %1583 = vset.pattern.permute.xlu0 %v1778_v37  ;;  %v2143_v37 = vrot.slane %v2066_v47, %v2096_v59  ;;  %v180_v59 = vadd.f32 %v179_v0, %v173_v63  ;;  %v2180_v63 = vmul.f32 %v1988_v24, %v1974_v19  ;;  %v146_v47 = vmul.f32 %v139_v21, %v1978_v20 }
  0xf0   :  { %v155_v21 = vmul.f32 %v140_v23, %v1974_v19 }
  0xf1   :  { %v2040_v38 = vpop.permute.xlu1 %221  ;;  %v2042_v39 = vpop.permute.xlu0 %223  ;;  %3447 = vst [vmem:[#allocation29_spill] sm:$0xff] %v2143_v37  ;;  %v150_v24 = vsub.f32 %v114_v46, %v146_v47  ;;  %v208_v46 = vmul.f32 %v2025_v33, %v2011_v30 }
  0xf2   :  { %739 = vrot.lane.b32.xlu1 %v1897_v7, %s1775_s30  ;;  %882 = vperm.xlu0 %1583, %v1879_v2   ;;  %v227_v47 = vsel %vm197_vm1, %v2040_v38, %v2042_v39 }
  0xf5   :  { %v2047_v41 = vpop.permute.xlu1 %273  ;;  %v2049_v42 = vpop.permute.xlu0 %276 }
  0xf6   :  { %743 = vrot.lane.b32.xlu1 %v1905_v10, %s1775_s30  ;;  %889 = vrot.lane.b32.xlu0 %v1877_v1, %s1779_s0 }
  0xf9   :  { %v2057_v44 = vpop.permute.xlu1 %278  ;;  %v2059_v45 = vpop.permute.xlu0 %280 }
  0xfa   :  { %795 = vperm.xlu1 %1581, %v1879_v2   ;;  %910 = vperm.xlu0 %1583, %v1883_v3  }
  0xfd   :  { %v2070_v49 = vpop.permute.xlu1 %282  ;;  %v2072_v50 = vpop.permute.xlu0 %301 }
  0xfe   :  { %800 = vrot.lane.b32.xlu1 %v1891_v5, %s1777_s6  ;;  %915 = vrot.lane.b32.xlu0 %v1903_v9, %s1779_s0 }
  0xff   :  { %1585 = vset.pattern.permute.xlu0 %v1780_v56  ;;  %1584 = vset.pattern.permute.xlu1 %v1780_v56  ;;  %v138_v56 = vsel %vm105_vm0, %v1995_v26, %v1993_v25  ;;  %v184_v26 = vsub.f32 %v2127_v14, %v2124_v13  ;;  %v113_v25 = vmul.f32 %v106_v53, %v1974_v19  ;;  %vm1473_vm0 = vcmask 252932  }
 0x100   :  { %v145_v0 = vmul.f32 %v138_v56, %v1978_v20  ;;  %v153_v51 = vmul.f32 %v138_v56, %v1974_v19  ;;  %v148_v13 = vmul.f32 %v2001_v27, %v1978_v20  ;;  %v2202_v56 = vmul.f32 %v140_v23, %v1978_v20 }
 0x101   :  { %v2091_v57 = vpop.permute.xlu1 %304  ;;  %v2093_v58 = vpop.permute.xlu0 %308  ;;  %v199_v53 = vsel %vm197_vm1, %v2017_v31, %v2019_v32  ;;  %v162_v27 = vmul.f32 %v1978_v20, %v107_v54  ;;  %v260_v54 = vmul.f32 %v2103_v61, %v2011_v30  ;;  %v168_v20 = vadd.f32 %v164_v40, %v156_v28 }
 0x102   :  { %804 = vrot.lane.b32.xlu1 %v1895_v6, %s1777_s6  ;;  %919 = vrot.lane.b32.xlu0 %v1911_v12, %s1779_s0  ;;  %v149_v29 = vsub.f32 %v113_v25, %v145_v0  ;;  %v152_v37 = vsub.f32 %v2180_v63, %v148_v13  ;;  %v167_v63 = vadd.f32 %v163_v52, %v155_v21  ;;  %v1782_v21 = vmov 11  }
 0x103   :  { %v2237_v23 = vmul.f32 %v2107_v62, %v2011_v30  ;;  %v200_v25 = vsel %vm197_vm1, %v2019_v32, %v2025_v33  ;;  %v261_v32 = vadd.f32 %v260_v54, %v180_v59  ;;  %v266_v13 = vmul.f32 %v2107_v62, %v2027_v34 }
 0x104   :  { %v243_v28 = vmul.f32 %v2042_v39, %v2011_v30 }
 0x105   :  { %v2137_v17 = vpop.permute.xlu1 %306  ;;  %v2139_v22 = vpop.permute.xlu0 %360 }
 0x106   :  { %826 = vrot.lane.b32.xlu1 %v1897_v7, %s1777_s6  ;;  %972 = vrot.lane.b32.xlu0 %v1885_v4, %s1781_s7 }
 0x109   :  { %v2190_v14 = vpop.permute.xlu1 %310  ;;  %v2192_v18 = vpop.permute.xlu0 %367 }
 0x10a   :  { %3451 = vst [vmem:[#allocation33_spill] sm:$0xff] %v2190_v14  ;;  %3452 = vst [vmem:[#allocation34_spill] sm:$0xff] %v2192_v18  ;;  %828 = vrot.lane.b32.xlu1 %v1903_v9, %s1777_s6  ;;  %976 = vrot.lane.b32.xlu0 %v1877_v1, %s1781_s7  ;;  %v115_v9 = vmul.f32 %v108_v60, %v1974_v19  ;;  %v165_v18 = vadd.f32 %v161_v48, %v153_v51 }
 0x10b   :  { %v205_v14 = vmul.f32 %v198_v55, %v2011_v30  ;;  %v206_v60 = vmul.f32 %v199_v53, %v2011_v30  ;;  %v225_v19 = vsel %vm197_vm1, %v2032_v35, %v2034_v36  ;;  %v166_v51 = vadd.f32 %v162_v27, %v154_v43 }
 0x10c   :  { %v151_v48 = vsub.f32 %v115_v9, %v2202_v56  ;;  %v268_v35 = vmul.f32 %v2103_v61, %v2027_v34  ;;  %v240_v9 = vmul.f32 %v225_v19, %v2011_v30  ;;  %v226_v43 = vsel %vm197_vm1, %v2034_v36, %v2040_v38 }
 0x10d   :  { %v2220_v31 = vpop.permute.xlu1 %363  ;;  %v2222_v16 = vpop.permute.xlu0 %388  ;;  %v209_v0 = vadd.f32 %v205_v14, %v149_v29  ;;  %v2257_v61 = vadd.f32 %v206_v60, %v150_v24  ;;  %v207_v36 = vmul.f32 %v200_v25, %v2011_v30  ;;  %v248_v38 = vmul.f32 %v2027_v34, %v198_v55 }
 0x10e   :  { %832 = vrot.lane.b32.xlu1 %v1911_v12, %s1777_s6  ;;  %997 = vperm.xlu0 %1585, %v1883_v3   ;;  %v249_v56 = vmul.f32 %v2027_v34, %v199_v53  ;;  %v269_v59 = vadd.f32 %v268_v35, %v184_v26  ;;  %v232_v14 = vmul.f32 %v225_v19, %v2027_v34  ;;  %vm1487_vm1 = vcmask 519168  }
 0x10f   :  { %v241_v62 = vmul.f32 %v226_v43, %v2011_v30  ;;  %v242_v27 = vmul.f32 %v227_v47, %v2011_v30  ;;  %v212_v29 = vadd.f32 %v208_v46, %v152_v37  ;;  %v244_v54 = vadd.f32 %v240_v9, %v165_v18 }
 0x110   :  { %v235_v60 = vmul.f32 %v2042_v39, %v2027_v34  ;;  %v250_v55 = vmul.f32 %v2027_v34, %v200_v25  ;;  %v267_v26 = vadd.f32 %v266_v13, %v261_v32  ;;  %v233_v19 = vmul.f32 %v226_v43, %v2027_v34 }
 0x111   :  { %v2253_v40 = vpop.permute.xlu1 %365  ;;  %v2255_v52 = vpop.permute.xlu0 %393  ;;  %v285_v30 = vsel %vm284_vm2, %v2049_v42, %v2057_v44  ;;  %v251_v37 = vmul.f32 %v2027_v34, %v2025_v33  ;;  %v211_v39 = vadd.f32 %v207_v36, %v151_v48  ;;  %v234_v18 = vmul.f32 %v227_v47, %v2027_v34 }
 0x112   :  { %885 = vrot.lane.b32.xlu1 %v1885_v4, %s1779_s0  ;;  %1004 = vrot.lane.b32.xlu0 %v1905_v10, %s1781_s7  ;;  %v247_v25 = vadd.f32 %v243_v28, %v168_v20  ;;  %v286_v35 = vsel %vm284_vm2, %v2057_v44, %v2059_v45  ;;  %v236_v46 = vsub.f32 %v209_v0, %v232_v14 }
 0x113   :  { %1586 = vset.pattern.permute.xlu0 %v1782_v21  ;;  %v245_v9 = vadd.f32 %v241_v62, %v166_v51  ;;  %v246_v43 = vadd.f32 %v242_v27, %v167_v63  ;;  %v271_v42 = vsub.f32 %v269_v59, %v2237_v23  ;;  %v239_v32 = vsub.f32 %v212_v29, %v235_v60 }
 0x114   :  { %v347_v33 = vmul.f32 %v2115_v8, %v2047_v41  ;;  %v292_v48 = vmul.f32 %v285_v30, %v2047_v41  ;;  %v2297_v13 = vadd.f32 %v248_v38, %v244_v54  ;;  %v237_v44 = vsub.f32 %v2257_v61, %v233_v19 }
 0x115   :  { %v2276_v53 = vpop.permute.xlu1 %369  ;;  %v2278_v24 = vpop.permute.xlu0 %397  ;;  %v293_v47 = vmul.f32 %v286_v35, %v2047_v41  ;;  %v287_v51 = vsel %vm284_vm2, %v2059_v45, %v2070_v49  ;;  %v355_v63 = vmul.f32 %v2115_v8, %v2072_v50  ;;  %v238_v23 = vsub.f32 %v211_v39, %v234_v18  ;;  %v3454_v18 = vld [vmem:[#allocation28_spill] sm:$0xff] }
 0x116   :  { %887 = vrot.lane.b32.xlu1 %v1891_v5, %s1779_s0  ;;  %1056 = vperm.xlu0 %1586, %v1879_v2   ;;  %v2314_v0 = vmul.f32 %v2119_v11, %v2047_v41  ;;  %v295_v61 = vmul.f32 %v2070_v49, %v2047_v41  ;;  %v255_v36 = vadd.f32 %v251_v37, %v247_v25 }
 0x117   :  { %v353_v45 = vmul.f32 %v2119_v11, %v2072_v50  ;;  %v253_v8 = vadd.f32 %v249_v56, %v245_v9  ;;  %v313_v28 = vsel %vm284_vm2, %v2137_v17, %v2093_v58  ;;  %v254_v38 = vadd.f32 %v250_v55, %v246_v43 }
 0x118   :  { %v348_v59 = vadd.f32 %v347_v33, %v267_v26  ;;  %v2325_v14 = vadd.f32 %v292_v48, %v236_v46  ;;  %v294_v62 = vmul.f32 %v287_v51, %v2047_v41  ;;  %v312_v27 = vsel %vm284_vm2, %v2091_v57, %v2137_v17  ;;  %v3455_v48 = vld [vmem:[#allocation29_spill] sm:$0xff] }
 0x119   :  { %v2299_v34 = vpop.permute.xlu1 %391  ;;  %v2301_v20 = vpop.permute.xlu0 %450  ;;  %v2335_v11 = vadd.f32 %v293_v47, %v237_v44  ;;  %v356_v56 = vadd.f32 %v355_v63, %v271_v42  ;;  %v434_v54 = vmul.f32 %v2131_v15, %v2139_v22  ;;  %v2341_v60 = vmul.f32 %v2072_v50, %v2070_v49  ;;  %v3453_v49 = vld [vmem:[#allocation33_spill] sm:$0xff] }
 0x11a   :  { %891 = vrot.lane.b32.xlu1 %v1895_v6, %s1779_s0  ;;  %1063 = vrot.lane.b32.xlu0 %v1877_v1, %s1783_s8  ;;  %v2345_v55 = vadd.f32 %v295_v61, %v239_v32  ;;  %v328_v57 = vmul.f32 %v313_v28, %v2047_v41  ;;  %v2349_v17 = vmul.f32 %v2072_v50, %v285_v30  ;;  %v1784_v61 = vmov 12  }
 0x11b   :  { %v336_v26 = vmul.f32 %v2072_v50, %v286_v35  ;;  %v354_v19 = vadd.f32 %v353_v45, %v348_v59  ;;  %v2354_v37 = vmul.f32 %v312_v27, %v2072_v50  ;;  %v314_v39 = vsel %vm284_vm2, %v2093_v58, %v3453_v49  ;;  %vm3349_vm2 = vmor %vm1473_vm0, %vm1472_vm15 }
 0x11c   :  { %v440_v25 = vmul.f32 %v3454_v18, %v2222_v16  ;;  %v2361_v46 = vadd.f32 %v294_v62, %v238_v23  ;;  %v2364_v30 = vmul.f32 %v313_v28, %v2072_v50  ;;  %v327_v35 = vmul.f32 %v312_v27, %v2047_v41 }
 0x11d   :  { %v2331_v21 = vpop.permute.xlu1 %395  ;;  %v2333_v29 = vpop.permute.xlu0 %454  ;;  %v337_v9 = vmul.f32 %v2072_v50, %v287_v51  ;;  %v435_v32 = vadd.f32 %v434_v54, %v354_v19  ;;  %v444_v58 = vmul.f32 %v3454_v18, %v2139_v22  ;;  %v358_v33 = vsub.f32 %v356_v56, %v2314_v0 }
 0x11e   :  { %913 = vrot.lane.b32.xlu1 %v1897_v7, %s1779_s0  ;;  %1084 = vperm.xlu0 %1586, %v1883_v3   ;;  %v332_v47 = vadd.f32 %v328_v57, %v253_v8  ;;  %v329_v63 = vmul.f32 %v314_v39, %v2047_v41  ;;  %v330_v51 = vmul.f32 %v3453_v49, %v2047_v41 }
 0x11f   :  { %v442_v23 = vmul.f32 %v2131_v15, %v2222_v16  ;;  %v323_v0 = vsub.f32 %v2325_v14, %v2354_v37  ;;  %v2387_v45 = vmul.f32 %v314_v39, %v2072_v50  ;;  %v2391_v28 = vmul.f32 %v3453_v49, %v2072_v50  ;;  %v3456_v14 = vld [vmem:[#allocation34_spill] sm:$0xff] }
 0x120   :  { %v441_v8 = vadd.f32 %v440_v25, %v435_v32  ;;  %v324_v41 = vsub.f32 %v2335_v11, %v2364_v30  ;;  %v2397_v15 = vadd.f32 %v327_v35, %v2297_v13  ;;  %v2402_v59 = vsel %vm371_vm3, %v2220_v31, %v2253_v40  ;;  %v3457_v13 = vld [vmem:[#allocation30_spill] sm:$0xff] }
 0x121   :  { %v2368_v43 = vpop.permute.xlu1 %447  ;;  %v2370_v42 = vpop.permute.xlu0 %475  ;;  %v373_v62 = vsel %vm371_vm3, %v2253_v40, %v3456_v14  ;;  %v400_v11 = vsel %vm371_vm3, %v2255_v52, %v2331_v21  ;;  %v333_v57 = vadd.f32 %v329_v63, %v254_v38  ;;  %v334_v40 = vadd.f32 %v330_v51, %v255_v36 }
 0x122   :  { %v521_v44 = vmul.f32 %v3455_v48, %v2368_v43  ;;  %917 = vrot.lane.b32.xlu1 %v1905_v10, %s1779_s0  ;;  %1587 = vset.pattern.permute.xlu0 %v1784_v61  ;;  %v527_v54 = vmul.f32 %v3457_v13, %v2370_v42  ;;  %v340_v19 = vadd.f32 %v336_v26, %v332_v47  ;;  %v1785_v32 = vmov 13  }
 0x123   :  { %1143 = vperm.xlu0 %1587, %v1879_v2   ;;  %v443_v37 = vadd.f32 %v442_v23, %v358_v33  ;;  %v325_v49 = vsub.f32 %v2361_v46, %v2387_v45  ;;  %v326_v39 = vsub.f32 %v2345_v55, %v2391_v28  ;;  %v379_v18 = vmul.f32 %v2402_v59, %v2139_v22 }
 0x124   :  { %v522_v56 = vadd.f32 %v521_v44, %v441_v8  ;;  %v380_v38 = vmul.f32 %v373_v62, %v2139_v22  ;;  %v374_v36 = vsel %vm371_vm3, %v3456_v14, %v2276_v53  ;;  %v415_v26 = vmul.f32 %v400_v11, %v2139_v22 }
 0x125   :  { %v2407_v50 = vpop.permute.xlu1 %452  ;;  %v2409_v27 = vpop.permute.xlu0 %482  ;;  %v529_v46 = vmul.f32 %v3455_v48, %v2370_v42  ;;  %v401_v33 = vsel %vm371_vm3, %v2331_v21, %v2278_v24  ;;  %v3458_v48 = vld [vmem:[#allocation31_spill] sm:$0xff]  ;;  %v342_v51 = vadd.f32 %v2341_v60, %v334_v40  ;;  %v341_v23 = vadd.f32 %v337_v9, %v333_v57 }
 0x126   :  { %v460_v31 = vsel %vm458_vm4, %v2407_v50, %v2333_v29  ;;  %969 = vperm.xlu1 %1584, %v1879_v2   ;;  %v528_v44 = vadd.f32 %v527_v54, %v522_v56  ;;  %v445_v45 = vsub.f32 %v443_v37, %v444_v58  ;;  %v423_v21 = vmul.f32 %v2222_v16, %v373_v62 }
 0x127   :  { %v2427_v25 = vmul.f32 %v2370_v42, %v460_v31  ;;  %1093 = vrot.lane.b32.xlu0 %v1911_v12, %s1783_s8  ;;  %v381_v14 = vmul.f32 %v374_v36, %v2139_v22  ;;  %v407_v54 = vmul.f32 %v400_v11, %v2222_v16  ;;  %v416_v60 = vmul.f32 %v401_v33, %v2139_v22 }
 0x128   :  { %1589 = vset.pattern.permute.xlu0 %v1785_v32  ;;  %v419_v9 = vadd.f32 %v415_v26, %v340_v19  ;;  %v530_v58 = vadd.f32 %v529_v46, %v445_v45  ;;  %v384_v62 = vadd.f32 %v380_v38, %v324_v41  ;;  %v382_v37 = vmul.f32 %v2276_v53, %v2139_v22 }
 0x129   :  { %v2438_v30 = vpop.permute.xlu1 %456  ;;  %v2440_v35 = vpop.permute.xlu0 %534  ;;  %v425_v32 = vmul.f32 %v2222_v16, %v2276_v53  ;;  %v2476_v11 = vmul.f32 %v2278_v24, %v2222_v16  ;;  %v467_v41 = vmul.f32 %v460_v31, %v2368_v43  ;;  %v385_v53 = vadd.f32 %v381_v14, %v325_v49 }
 0x12a   :  { %v461_v47 = vsel %vm458_vm4, %v2333_v29, %v2438_v30  ;;  %974 = vrot.lane.b32.xlu1 %v1891_v5, %s1781_s7  ;;  %v608_v63 = vmul.f32 %v3458_v48, %v2440_v35  ;;  %v417_v29 = vmul.f32 %v2278_v24, %v2139_v22  ;;  %v408_v38 = vmul.f32 %v401_v33, %v2222_v16 }
 0x12b   :  { %v2454_v8 = vmul.f32 %v2370_v42, %v461_v47  ;;  %1588 = vset.pattern.permute.xlu1 %v1784_v61  ;;  %1230 = vperm.xlu0 %1589, %v1879_v2   ;;  %v2465_v61 = vadd.f32 %v379_v18, %v323_v0  ;;  %v424_v2 = vmul.f32 %v2222_v16, %v374_v36 }
 0x12c   :  { %v609_v56 = vadd.f32 %v608_v63, %v528_v44  ;;  %v531_v0 = vmul.f32 %v3457_v13, %v2368_v43  ;;  %v421_v19 = vadd.f32 %v417_v29, %v342_v51  ;;  %v399_v18 = vsel %vm371_vm3, %v2299_v34, %v2255_v52  ;;  %v3459_v52 = vld [vmem:[#allocation32_spill] sm:$0xff] }
 0x12d   :  { %v479_v57 = vpop.permute.xlu1 %478  ;;  %v2463_v40 = vpop.permute.xlu0 %541  ;;  %v411_v36 = vsub.f32 %v384_v62, %v407_v54  ;;  %v420_v24 = vadd.f32 %v416_v60, %v341_v23  ;;  %v427_v44 = vadd.f32 %v423_v21, %v419_v9  ;;  %v468_v63 = vmul.f32 %v461_v47, %v2368_v43 }
 0x12e   :  { %978 = vrot.lane.b32.xlu1 %v1895_v6, %s1781_s7  ;;  %v532_v26 = vsub.f32 %v530_v58, %v531_v0  ;;  %v406_v45 = vmul.f32 %v399_v18, %v2222_v16  ;;  %v429_v21 = vadd.f32 %v425_v32, %v421_v19  ;;  %v412_v29 = vsub.f32 %v385_v53, %v408_v38  ;;  %v3460_v32 = vld [vmem:[#allocation18_spill] sm:$0xff] }
 0x12f   :  { %1150 = vrot.lane.b32.xlu0 %v1877_v1, %s1786_s9  ;;  %v2499_v1 = vmul.f32 %v3459_v52, %v2440_v35  ;;  %v2501_v33 = vadd.f32 %v467_v41, %v411_v36  ;;  %v428_v54 = vadd.f32 %v424_v2, %v420_v24  ;;  %v2522_v62 = vsel %vm458_vm4, %v2301_v20, %v2407_v50 }
 0x130   :  { %v2531_v0 = vadd.f32 %v468_v63, %v412_v29  ;;  %v386_v50 = vadd.f32 %v382_v37, %v326_v39  ;;  %v414_v36 = vmul.f32 %v399_v18, %v2139_v22  ;;  %v466_v24 = vmul.f32 %v2522_v62, %v2368_v43 }
 0x131   :  { %v481_v46 = vpop.permute.xlu1 %480  ;;  %v2487_v13 = vpop.permute.xlu0 %562  ;;  %v339_v22 = vadd.f32 %v2349_v17, %v2397_v15  ;;  %v410_v37 = vsub.f32 %v2465_v61, %v406_v45 }
 0x132   :  { %v487_v31 = vsel %vm458_vm4, %v481_v46, %v2409_v27  ;;  %1000 = vrot.lane.b32.xlu1 %v1897_v7, %s1781_s7  ;;  %v614_v34 = vmul.f32 %v3459_v52, %v2487_v13  ;;  %v616_v49 = vmul.f32 %v3458_v48, %v2487_v13  ;;  %v486_v53 = vsel %vm458_vm4, %v479_v57, %v481_v46  ;;  %v3461_v52 = vld [vmem:[#allocation19_spill] sm:$0xff] }
 0x133   :  { %v2505_v51 = vmul.f32 %v487_v31, %v2370_v42  ;;  %v502_v23 = vmul.f32 %v487_v31, %v2368_v43  ;;  %1174 = vrot.lane.b32.xlu0 %v1897_v7, %s1786_s9  ;;  %v493_v18 = vmul.f32 %v486_v53, %v2370_v42  ;;  %v413_v17 = vsub.f32 %v386_v50, %v2476_v11 }
 0x134   :  { %v2511_v48 = vadd.f32 %v614_v34, %v609_v56  ;;  %v2513_v14 = vadd.f32 %v616_v49, %v532_v26  ;;  %v2574_v34 = vsub.s32 6, %v3461_v52  ;;  %v422_v49 = vmul.f32 %v2222_v16, %v2402_v59 }
 0x135   :  { %v498_v47 = vsub.f32 %v2501_v33, %v2505_v51  ;;  %v506_v60 = vadd.f32 %v502_v23, %v427_v44  ;;  %v485_v9 = vpop.permute.xlu1 %484  ;;  %v2517_v58 = vpop.permute.xlu0 %567  ;;  %v469_v44 = vmul.f32 %v2438_v30, %v2368_v43  ;;  %v418_v15 = vadd.f32 %v414_v36, %v339_v22 }
 0x136   :  { %v488_v7 = vsel %vm458_vm4, %v2409_v27, %v485_v9  ;;  %v504_v56 = vmul.f32 %v485_v9, %v2368_v43  ;;  %1002 = vrot.lane.b32.xlu1 %v3460_v32, %s1781_s7  ;;  %v619_v2 = vsub.f32 %v2513_v14, %v2499_v1  ;;  %v512_v27 = vmul.f32 %v2370_v42, %v2438_v30 }
 0x137   :  { %v2534_v41 = vmul.f32 %v488_v7, %v2370_v42  ;;  %v503_v19 = vmul.f32 %v488_v7, %v2368_v43  ;;  %v2538_v20 = vadd.f32 %v2427_v25, %v506_v60  ;;  %1178 = vrot.lane.b32.xlu0 %v1905_v10, %s1786_s9  ;;  %v470_v61 = vadd.f32 %v466_v24, %v410_v37  ;;  %v3462_v7 = vld [vmem:[#allocation21_spill] sm:$0xff] }
 0x138   :  { %v508_v38 = vadd.f32 %v504_v56, %v429_v21  ;;  %v496_v30 = vmul.f32 %v485_v9, %v2370_v42  ;;  %v473_v45 = vadd.f32 %v469_v44, %v413_v17  ;;  %v1788_v9 = vmov 14  }
 0x139   :  { %v499_v25 = vsub.f32 %v2531_v0, %v2534_v41  ;;  %v507_v26 = vadd.f32 %v503_v19, %v428_v54  ;;  %v538_v55 = vpop.permute.xlu1 %537  ;;  %v2553_v28 = vpop.permute.xlu0 %571  ;;  %v497_v16 = vsub.f32 %v470_v61, %v493_v18  ;;  %v694_v56 = vrot.slane %v3462_v7, %v2574_v34 }
 0x13a   :  { %v516_v39 = vadd.f32 %v512_v27, %v508_v38  ;;  %v2557_v57 = vmul.f32 %v2553_v28, %v2487_v13  ;;  %v591_v10 = vmul.f32 %v2553_v28, %v2440_v35  ;;  %1006 = vrot.lane.b32.xlu1 %v1911_v12, %s1781_s7  ;;  %v500_v0 = vsub.f32 %v473_v45, %v496_v30  ;;  %v2614_v38 = vld [vmem:[#allocation5 + $0x8] sm:$0xff]  ;;  %v2661_v30 = vld [vmem:[#allocation5 + $0x18] sm:$0xff] }
 0x13b   :  { %v2568_v46 = vadd.f32 %v2454_v8, %v507_v26  ;;  %1258 = vperm.xlu0 %1589, %v1883_v3   ;;  %v501_v8 = vmul.f32 %v486_v53, %v2368_v43  ;;  %v426_v43 = vadd.f32 %v422_v49, %v418_v15  ;;  %v509_v36 = vmul.f32 %v2370_v42, %v2522_v62  ;;  %v2635_v62 = vld [vmem:[#allocation5 + $0x10] sm:$0xff] }
 0x13c   :  { %v595_v31 = vadd.f32 %v591_v10, %v516_v39  ;;  %v2645_v44 = vsub.s32 7, %v3461_v52 }
 0x13d   :  { %v540_v33 = vpop.permute.xlu1 %539  ;;  %v2579_v63 = vpop.permute.xlu0 %624 }
 0x13e   :  { %v546_v51 = vsel %vm545_vm5, %v538_v55, %v540_v33  ;;  %v547_v3 = vsel %vm545_vm5, %v540_v33, %v2463_v40  ;;  %1059 = vrot.lane.b32.xlu1 %v1885_v4, %s1783_s8 }
 0x13f   :  { %v553_v59 = vmul.f32 %v546_v51, %v2440_v35  ;;  %v554_v11 = vmul.f32 %v547_v3, %v2440_v35  ;;  %v2591_v23 = vmul.f32 %v2487_v13, %v547_v3  ;;  %1233 = vrot.lane.b32.xlu0 %v1885_v4, %s1787_s10  ;;  %v596_v61 = vmul.f32 %v2487_v13, %v546_v51 }
 0x140   :  { %1591 = vset.pattern.permute.xlu0 %v1788_v9  ;;  %v781_v3 = vrot.slane %v3462_v7, %v2645_v44 }
 0x141   :  { %v2595_v21 = vadd.f32 %v553_v59, %v497_v16  ;;  %v2597_v29 = vadd.f32 %v554_v11, %v498_v47  ;;  %v544_v54 = vpop.permute.xlu1 %543  ;;  %v2599_v60 = vpop.permute.xlu0 %628  ;;  %v505_v47 = vadd.f32 %v501_v8, %v426_v43 }
 0x142   :  { %v548_v41 = vsel %vm545_vm5, %v2463_v40, %v544_v54  ;;  %v556_v4 = vmul.f32 %v544_v54, %v2440_v35  ;;  %v599_v19 = vmul.f32 %v2487_v13, %v544_v54  ;;  %1061 = vrot.lane.b32.xlu1 %v1891_v5, %s1783_s8 }
 0x143   :  { %v555_v50 = vmul.f32 %v548_v41, %v2440_v35  ;;  %v598_v27 = vmul.f32 %v2487_v13, %v548_v41  ;;  %1237 = vrot.lane.b32.xlu0 %v2614_v38, %s1787_s10  ;;  %v513_v37 = vadd.f32 %v509_v36, %v505_v47 }
 0x144   :  { %v2612_v53 = vadd.f32 %v556_v4, %v500_v0  ;;  %v2618_v40 = vadd.f32 %v599_v19, %v595_v31 }
 0x145   :  { %v566_v24 = vpop.permute.xlu1 %565  ;;  %v2622_v26 = vpop.permute.xlu0 %649  ;;  %v2624_v55 = vadd.f32 %v555_v50, %v499_v25 }
 0x146   :  { %v573_v39 = vsel %vm545_vm5, %v566_v24, %v2517_v58  ;;  %1065 = vrot.lane.b32.xlu1 %v1895_v6, %s1783_s8  ;;  %v587_v10 = vsub.f32 %v2612_v53, %v2557_v57  ;;  %v703_v22 = vmul.f32 %v694_v56, %v2622_v26 }
 0x147   :  { %v580_v18 = vmul.f32 %v573_v39, %v2487_v13  ;;  %v588_v42 = vmul.f32 %v573_v39, %v2440_v35  ;;  %1261 = vrot.lane.b32.xlu0 %v2635_v62, %s1787_s10 }
 0x148   :  { %v2642_v25 = vadd.f32 %v703_v22, %v619_v2  ;;  %v1790_v22 = vmov 15  }
 0x149   :  { %v584_v31 = vsub.f32 %v2595_v21, %v580_v18  ;;  %v592_v49 = vadd.f32 %v588_v42, %v513_v37  ;;  %v570_v17 = vpop.permute.xlu1 %569  ;;  %v2648_v15 = vpop.permute.xlu0 %656 }
 0x14a   :  { %v574_v33 = vsel %vm545_vm5, %v2517_v58, %v570_v17  ;;  %v575_v8 = vsel %vm545_vm5, %v570_v17, %v2553_v28  ;;  %1087 = vrot.lane.b32.xlu1 %v2635_v62, %s1783_s8  ;;  %v3463_v28 = vld [vmem:[#allocation22_spill] sm:$0xff] }
 0x14b   :  { %v581_v1 = vmul.f32 %v574_v33, %v2487_v13  ;;  %v582_v14 = vmul.f32 %v575_v8, %v2487_v13  ;;  %v589_v2 = vmul.f32 %v574_v33, %v2440_v35  ;;  %v590_v52 = vmul.f32 %v575_v8, %v2440_v35  ;;  %1265 = vrot.lane.b32.xlu0 %v2661_v30, %s1787_s10 }
 0x14c   :  { %v2665_v58 = vadd.f32 %v596_v61, %v592_v49  ;;  %v700_v51 = vrot.slane %v3463_v28, %v2574_v34 }
 0x14d   :  { %v585_v16 = vsub.f32 %v2597_v29, %v581_v1  ;;  %v586_v13 = vsub.f32 %v2624_v55, %v582_v14  ;;  %v593_v59 = vadd.f32 %v589_v2, %v2538_v20  ;;  %v594_v35 = vadd.f32 %v590_v52, %v2568_v46  ;;  %v2675_v11 = vpop.permute.xlu1 %621  ;;  %v2677_v45 = vpop.permute.xlu0 %708  ;;  %v2688_v20 = vld [vmem:[#allocation2 + $0x4] sm:$0xf] }
 0x14e   :  { %1089 = vrot.lane.b32.xlu1 %v3460_v32, %s1783_s8  ;;  %v695_v43 = vmul.f32 %v694_v56, %v2675_v11  ;;  %v701_v21 = vmul.f32 %v700_v51, %v2622_v26  ;;  %v782_v7 = vmul.f32 %v781_v3, %v2677_v45  ;;  %v787_v56 = vrot.slane %v3463_v28, %v2645_v44 }
 0x14f   :  { %v2684_v29 = vadd.f32 %v2591_v23, %v593_v59  ;;  %v2686_v54 = vadd.f32 %v598_v27, %v594_v35  ;;  %1345 = vperm.xlu0 %1591, %v2688_v20  }
 0x150   :  { %v696_v46 = vadd.f32 %v695_v43, %v2511_v48  ;;  %v705_v48 = vmul.f32 %v700_v51, %v2675_v11  ;;  %v2716_v37 = vmul.f32 %v787_v56, %v2677_v45  ;;  %v2745_v51 = vld [vmem:[#allocation5] sm:$0xff] }
 0x151   :  { %v627_v0 = vpop.permute.xlu1 %626  ;;  %v2693_v41 = vpop.permute.xlu0 %715 }
 0x152   :  { %v633_v23 = vsel %vm632_vm6, %v2579_v63, %v627_v0  ;;  %v634_v4 = vsel %vm632_vm6, %v627_v0, %v2599_v60  ;;  %1091 = vrot.lane.b32.xlu1 %v2661_v30, %s1783_s8  ;;  %v702_v19 = vadd.f32 %v701_v21, %v696_v46 }
 0x153   :  { %v640_v47 = vmul.f32 %v633_v23, %v2675_v11  ;;  %v641_v50 = vmul.f32 %v634_v4, %v2675_v11  ;;  %v683_v27 = vmul.f32 %v2622_v26, %v633_v23  ;;  %v684_v36 = vmul.f32 %v2622_v26, %v634_v4  ;;  %1322 = vrot.lane.b32.xlu0 %v1891_v5, %s1789_s11 }
 0x154   :  { %v783_v63 = vadd.f32 %v782_v7, %v702_v19  ;;  %1593 = vset.pattern.permute.xlu0 %v1790_v22 }
 0x155   :  { %v2710_v24 = vadd.f32 %v640_v47, %v584_v31  ;;  %v2712_v55 = vadd.f32 %v641_v50, %v585_v16  ;;  %v631_v39 = vpop.permute.xlu1 %630  ;;  %v2722_v17 = vpop.permute.xlu0 %736  ;;  %v706_v31 = vsub.f32 %v2642_v25, %v705_v48 }
 0x156   :  { %v635_v18 = vsel %vm632_vm6, %v2599_v60, %v631_v39  ;;  %v643_v42 = vmul.f32 %v631_v39, %v2675_v11  ;;  %v686_v49 = vmul.f32 %v2622_v26, %v631_v39  ;;  %1171 = vperm.xlu1 %1588, %v2688_v20   ;;  %v788_v8 = vmul.f32 %v787_v56, %v2722_v17 }
 0x157   :  { %v642_v61 = vmul.f32 %v635_v18, %v2675_v11  ;;  %v685_v33 = vmul.f32 %v2622_v26, %v635_v18  ;;  %v790_v1 = vmul.f32 %v781_v3, %v2722_v17  ;;  %1326 = vrot.lane.b32.xlu0 %v1895_v6, %s1789_s11  ;;  %v2793_v18 = vld [vmem:[#allocation7 + $0x8] sm:$0xff] }
 0x158   :  { %v2733_v60 = vadd.f32 %v643_v42, %v587_v10  ;;  %v2739_v25 = vadd.f32 %v788_v8, %v783_v63 }
 0x159   :  { %v2737_v14 = vadd.f32 %v642_v61, %v586_v13  ;;  %v653_v2 = vpop.permute.xlu1 %652  ;;  %v2741_v52 = vadd.f32 %v790_v1, %v706_v31  ;;  %v2743_v28 = vpop.permute.xlu0 %741 }
 0x15a   :  { %1146 = vrot.lane.b32.xlu1 %v2745_v51, %s1786_s9 }
 0x15b   :  { %1590 = vset.pattern.permute.xlu1 %v1788_v9  ;;  %v793_v57 = vsub.f32 %v2741_v52, %v2716_v37  ;;  %1350 = vrot.lane.b32.xlu0 %v3460_v32, %s1789_s11 }
 0x15d   :  { %v655_v53 = vpop.permute.xlu1 %654  ;;  %v2757_v16 = vpop.permute.xlu0 %745 }
 0x15e   :  { %v660_v10 = vsel %vm632_vm6, %v653_v2, %v655_v53  ;;  %v661_v3 = vsel %vm632_vm6, %v655_v53, %v2648_v15  ;;  %1148 = vrot.lane.b32.xlu1 %v1891_v5, %s1786_s9  ;;  %v2767_v43 = vmul.f32 %v2757_v16, %v2722_v17  ;;  %v765_v21 = vmul.f32 %v2757_v16, %v2677_v45 }
 0x15f   :  { %v667_v13 = vmul.f32 %v660_v10, %v2622_v26  ;;  %v668_v9 = vmul.f32 %v661_v3, %v2622_v26  ;;  %v675_v59 = vmul.f32 %v660_v10, %v2675_v11  ;;  %v676_v35 = vmul.f32 %v661_v3, %v2675_v11  ;;  %1354 = vrot.lane.b32.xlu0 %v1911_v12, %s1789_s11 }
 0x161   :  { %v671_v46 = vsub.f32 %v2710_v24, %v667_v13  ;;  %v672_v7 = vsub.f32 %v2712_v55, %v668_v9  ;;  %v679_v0 = vadd.f32 %v675_v59, %v2665_v58  ;;  %v680_v56 = vadd.f32 %v676_v35, %v2684_v29  ;;  %v659_v23 = vpop.permute.xlu1 %658  ;;  %v2781_v47 = vpop.permute.xlu0 %798  ;;  %v2823_v59 = vld [vmem:[#allocation2] sm:$0xf] }
 0x162   :  { %v662_v4 = vsel %vm632_vm6, %v2648_v15, %v659_v23  ;;  %v670_v19 = vmul.f32 %v659_v23, %v2622_v26  ;;  %v678_v48 = vmul.f32 %v659_v23, %v2675_v11  ;;  %1152 = vrot.lane.b32.xlu1 %v1895_v6, %s1786_s9 }
 0x163   :  { %v669_v50 = vmul.f32 %v662_v4, %v2622_v26  ;;  %v677_v63 = vmul.f32 %v662_v4, %v2675_v11  ;;  %v687_v58 = vadd.f32 %v683_v27, %v679_v0  ;;  %v2787_v24 = vadd.f32 %v684_v36, %v680_v56  ;;  %v3464_v11 = vld [vmem:[#allocation20_spill] sm:$0xff] }
 0x164   :  { %v674_v29 = vsub.f32 %v2733_v60, %v670_v19  ;;  %v682_v15 = vadd.f32 %v678_v48, %v2618_v40  ;;  %v868_v27 = vrot.slane %v2793_v18, %v3464_v11 }
 0x165   :  { %v673_v55 = vsub.f32 %v2737_v14, %v669_v50  ;;  %v681_v39 = vadd.f32 %v677_v63, %v2686_v54  ;;  %v712_v37 = vpop.permute.xlu1 %711  ;;  %v2795_v31 = vpop.permute.xlu0 %802  ;;  %v2845_v50 = vld [vmem:[#allocation8 + $0x8] sm:$0xff] }
 0x166   :  { %v690_v42 = vadd.f32 %v686_v49, %v682_v15  ;;  %1176 = vrot.lane.b32.xlu1 %v3460_v32, %s1786_s9 }
 0x167   :  { %v689_v26 = vadd.f32 %v685_v33, %v681_v39 }
 0x168   :  { %v769_v36 = vadd.f32 %v765_v21, %v690_v42 }
 0x169   :  { %v714_v40 = vpop.permute.xlu1 %713  ;;  %v2804_v8 = vpop.permute.xlu0 %823 }
 0x16a   :  { %v720_v61 = vsel %vm719_vm7, %v712_v37, %v714_v40  ;;  %v721_v54 = vsel %vm719_vm7, %v714_v40, %v2693_v41  ;;  %1180 = vrot.lane.b32.xlu1 %v1911_v12, %s1786_s9  ;;  %v877_v14 = vmul.f32 %v868_v27, %v2804_v8 }
 0x16b   :  { %v727_v49 = vmul.f32 %v720_v61, %v2677_v45  ;;  %v728_v1 = vmul.f32 %v721_v54, %v2677_v45  ;;  %v770_v33 = vmul.f32 %v2722_v17, %v720_v61  ;;  %v771_v60 = vmul.f32 %v2722_v17, %v721_v54 }
 0x16d   :  { %v2813_v2 = vadd.f32 %v727_v49, %v671_v46  ;;  %v2815_v52 = vadd.f32 %v728_v1, %v672_v7  ;;  %v718_v53 = vpop.permute.xlu1 %717  ;;  %v2821_v9 = vpop.permute.xlu0 %830  ;;  %v878_v46 = vadd.f32 %v877_v14, %v793_v57 }
 0x16e   :  { %v722_v10 = vsel %vm719_vm7, %v2693_v41, %v718_v53  ;;  %v730_v3 = vmul.f32 %v718_v53, %v2677_v45  ;;  %v773_v13 = vmul.f32 %v2722_v17, %v718_v53  ;;  %1317 = vperm.xlu1 %1590, %v2823_v59  }
 0x16f   :  { %v729_v35 = vmul.f32 %v722_v10, %v2677_v45  ;;  %v772_v21 = vmul.f32 %v2722_v17, %v722_v10 }
 0x170   :  { %v2828_v7 = vadd.f32 %v730_v3, %v674_v29  ;;  %v2830_v0 = vadd.f32 %v773_v13, %v769_v36 }
 0x171   :  { %v2832_v41 = vadd.f32 %v729_v35, %v673_v55  ;;  %v740_v56 = vpop.permute.xlu1 %739  ;;  %v2836_v4 = vpop.permute.xlu0 %882  ;;  %v3465_v55 = vld [vmem:[#allocation23_spill] sm:$0xff] }
 0x172   :  { %v747_v23 = vsel %vm719_vm7, %v740_v56, %v2743_v28  ;;  %1235 = vrot.lane.b32.xlu1 %v1891_v5, %s1787_s10  ;;  %v761_v19 = vsub.f32 %v2828_v7, %v2767_v43  ;;  %v955_v39 = vrot.slane %v2793_v18, %v3465_v55  ;;  %v3466_v43 = vld [vmem:[#allocation24_spill] sm:$0xff] }
 0x173   :  { %v754_v57 = vmul.f32 %v747_v23, %v2722_v17  ;;  %v762_v48 = vmul.f32 %v747_v23, %v2677_v45  ;;  %1592 = vset.pattern.permute.xlu1 %v1790_v22  ;;  %v874_v22 = vrot.slane %v2845_v50, %v3464_v11  ;;  %v2939_v7 = vrot.slane %v2793_v18, %v3466_v43 }
 0x175   :  { %v758_v63 = vsub.f32 %v2813_v2, %v754_v57  ;;  %v766_v29 = vadd.f32 %v762_v48, %v687_v58  ;;  %v744_v15 = vpop.permute.xlu1 %743  ;;  %v2854_v36 = vpop.permute.xlu0 %889 }
 0x176   :  { %v748_v37 = vsel %vm719_vm7, %v2743_v28, %v744_v15  ;;  %v749_v42 = vsel %vm719_vm7, %v744_v15, %v2757_v16  ;;  %1239 = vrot.lane.b32.xlu1 %v1895_v6, %s1787_s10  ;;  %v961_v16 = vrot.slane %v2845_v50, %v3465_v55 }
 0x177   :  { %v755_v58 = vmul.f32 %v748_v37, %v2722_v17  ;;  %v756_v40 = vmul.f32 %v749_v42, %v2722_v17  ;;  %v763_v61 = vmul.f32 %v748_v37, %v2677_v45  ;;  %v764_v54 = vmul.f32 %v749_v42, %v2677_v45 }
 0x178   :  { %v2864_v28 = vadd.f32 %v770_v33, %v766_v29  ;;  %v875_v45 = vmul.f32 %v874_v22, %v2804_v8  ;;  %v2886_v13 = vmul.f32 %v961_v16, %v2836_v4 }
 0x179   :  { %v759_v49 = vsub.f32 %v2815_v52, %v755_v58  ;;  %v760_v1 = vsub.f32 %v2832_v41, %v756_v40  ;;  %v767_v14 = vadd.f32 %v763_v61, %v2787_v24  ;;  %v768_v11 = vadd.f32 %v764_v54, %v689_v26  ;;  %v2871_v2 = vpop.permute.xlu1 %795  ;;  %v2874_v53 = vpop.permute.xlu0 %910 }
 0x17a   :  { %v869_v17 = vmul.f32 %v868_v27, %v2871_v2  ;;  %1263 = vrot.lane.b32.xlu1 %v3460_v32, %s1787_s10  ;;  %v879_v33 = vmul.f32 %v874_v22, %v2871_v2  ;;  %v964_v52 = vmul.f32 %v955_v39, %v2874_v53  ;;  %v956_v26 = vmul.f32 %v955_v39, %v2836_v4 }
 0x17b   :  { %v2880_v10 = vadd.f32 %v772_v21, %v768_v11  ;;  %v775_v24 = vadd.f32 %v771_v60, %v767_v14  ;;  %v962_v41 = vmul.f32 %v961_v16, %v2874_v53 }
 0x17c   :  { %v870_v3 = vadd.f32 %v869_v17, %v2739_v25  ;;  %v880_v27 = vsub.f32 %v878_v46, %v879_v33 }
 0x17d   :  { %v801_v35 = vpop.permute.xlu1 %800  ;;  %v2893_v23 = vpop.permute.xlu0 %915 }
 0x17e   :  { %v807_v56 = vsel %vm806_vm8, %v2781_v47, %v801_v35  ;;  %v808_v21 = vsel %vm806_vm8, %v801_v35, %v2795_v31  ;;  %1267 = vrot.lane.b32.xlu1 %v1911_v12, %s1787_s10  ;;  %v876_v60 = vadd.f32 %v875_v45, %v870_v3  ;;  %v965_v25 = vadd.f32 %v964_v52, %v880_v27 }
 0x17f   :  { %v814_v46 = vmul.f32 %v807_v56, %v2871_v2  ;;  %v815_v57 = vmul.f32 %v808_v21, %v2871_v2  ;;  %v857_v48 = vmul.f32 %v2804_v8, %v807_v56  ;;  %v858_v29 = vmul.f32 %v2804_v8, %v808_v21 }
 0x180   :  { %v957_v15 = vadd.f32 %v956_v26, %v876_v60  ;;  %v967_v47 = vsub.f32 %v965_v25, %v2886_v13 }
 0x181   :  { %v2902_v55 = vadd.f32 %v814_v46, %v758_v63  ;;  %v2904_v39 = vadd.f32 %v815_v57, %v759_v49  ;;  %v805_v37 = vpop.permute.xlu1 %804  ;;  %v2910_v40 = vpop.permute.xlu0 %919 }
 0x182   :  { %v809_v42 = vsel %vm806_vm8, %v2795_v31, %v805_v37  ;;  %v817_v22 = vmul.f32 %v805_v37, %v2871_v2  ;;  %v860_v58 = vmul.f32 %v2804_v8, %v805_v37  ;;  %1404 = vperm.xlu1 %1592, %v2823_v59   ;;  %v2913_v61 = vadd.f32 %v962_v41, %v957_v15 }
 0x183   :  { %v816_v54 = vmul.f32 %v809_v42, %v2871_v2  ;;  %v859_v63 = vmul.f32 %v2804_v8, %v809_v42  ;;  %v2919_v16 = vmul.f32 %v2910_v40, %v2874_v53  ;;  %v939_v31 = vmul.f32 %v2910_v40, %v2836_v4 }
 0x184   :  { %v821_v49 = vadd.f32 %v817_v22, %v761_v19 }
 0x185   :  { %v820_v14 = vadd.f32 %v816_v54, %v760_v1  ;;  %v827_v11 = vpop.permute.xlu1 %826  ;;  %v2926_v59 = vpop.permute.xlu0 %972 }
 0x186   :  { %1320 = vrot.lane.b32.xlu1 %v2745_v51, %s1789_s11 }
 0x189   :  { %v829_v17 = vpop.permute.xlu1 %828  ;;  %v2933_v52 = vpop.permute.xlu0 %976 }
 0x18a   :  { %v834_v45 = vsel %vm806_vm8, %v827_v11, %v829_v17  ;;  %v835_v33 = vsel %vm806_vm8, %v829_v17, %v2821_v9  ;;  %1324 = vrot.lane.b32.xlu1 %v2614_v38, %s1789_s11 }
 0x18b   :  { %v841_v19 = vmul.f32 %v834_v45, %v2804_v8  ;;  %v842_v1 = vmul.f32 %v835_v33, %v2804_v8  ;;  %v849_v26 = vmul.f32 %v834_v45, %v2871_v2  ;;  %v850_v3 = vmul.f32 %v835_v33, %v2871_v2 }
 0x18d   :  { %v845_v27 = vsub.f32 %v2902_v55, %v841_v19  ;;  %v846_v13 = vsub.f32 %v2904_v39, %v842_v1  ;;  %v853_v35 = vadd.f32 %v849_v26, %v2864_v28  ;;  %v854_v41 = vadd.f32 %v850_v3, %v775_v24  ;;  %v833_v38 = vpop.permute.xlu1 %832  ;;  %v2952_v25 = vpop.permute.xlu0 %997 }
 0x18e   :  { %v836_v56 = vsel %vm806_vm8, %v2821_v9, %v833_v38  ;;  %v844_v21 = vmul.f32 %v833_v38, %v2804_v8  ;;  %v852_v60 = vmul.f32 %v833_v38, %v2871_v2  ;;  %1348 = vrot.lane.b32.xlu1 %v2635_v62, %s1789_s11  ;;  %v1051_v28 = vmul.f32 %v2939_v7, %v2952_v25 }
 0x18f   :  { %v843_v46 = vmul.f32 %v836_v56, %v2804_v8  ;;  %v851_v57 = vmul.f32 %v836_v56, %v2871_v2  ;;  %v861_v24 = vadd.f32 %v857_v48, %v853_v35  ;;  %v862_v55 = vadd.f32 %v858_v29, %v854_v41 }
 0x190   :  { %v848_v15 = vsub.f32 %v821_v49, %v844_v21  ;;  %v856_v9 = vadd.f32 %v852_v60, %v2830_v0  ;;  %v2962_v22 = vadd.f32 %v1051_v28, %v967_v47  ;;  %v1048_v28 = vrot.slane %v2845_v50, %v3466_v43 }
 0x191   :  { %v847_v39 = vsub.f32 %v820_v14, %v843_v46  ;;  %v855_v37 = vadd.f32 %v851_v57, %v2880_v10  ;;  %v886_v42 = vpop.permute.xlu1 %885  ;;  %v2966_v62 = vpop.permute.xlu0 %1004 }
 0x192   :  { %v864_v54 = vadd.f32 %v860_v58, %v856_v9  ;;  %1352 = vrot.lane.b32.xlu1 %v2661_v30, %s1789_s11 }
 0x193   :  { %v863_v8 = vadd.f32 %v859_v63, %v855_v37 }
 0x194   :  { %v943_v2 = vadd.f32 %v939_v31, %v864_v54 }
 0x195   :  { %v888_v48 = vpop.permute.xlu1 %887  ;;  %v2972_v10 = vpop.permute.xlu0 %1056 }
 0x196   :  { %v894_v49 = vsel %vm893_vm9, %v886_v42, %v888_v48  ;;  %v895_v0 = vsel %vm893_vm9, %v888_v48, %v2854_v36  ;;  %1418 = vperm.xlu1 %1592, %v2688_v20  }
 0x197   :  { %v901_v29 = vmul.f32 %v894_v49, %v2836_v4  ;;  %v902_v47 = vmul.f32 %v895_v0, %v2836_v4  ;;  %v944_v30 = vmul.f32 %v2874_v53, %v894_v49  ;;  %v945_v58 = vmul.f32 %v2874_v53, %v895_v0 }
 0x199   :  { %v905_v63 = vadd.f32 %v901_v29, %v845_v27  ;;  %v906_v31 = vadd.f32 %v902_v47, %v846_v13  ;;  %v892_v14 = vpop.permute.xlu1 %891  ;;  %v2982_v45 = vpop.permute.xlu0 %1063 }
 0x19a   :  { %v896_v11 = vsel %vm893_vm9, %v2854_v36, %v892_v14  ;;  %v904_v17 = vmul.f32 %v892_v14, %v2836_v4  ;;  %v947_v20 = vmul.f32 %v2874_v53, %v892_v14 }
 0x19b   :  { %v903_v33 = vmul.f32 %v896_v11, %v2836_v4  ;;  %v946_v19 = vmul.f32 %v2874_v53, %v896_v11 }
 0x19c   :  { %v908_v1 = vadd.f32 %v904_v17, %v848_v15  ;;  %v2986_v26 = vadd.f32 %v947_v20, %v943_v2  ;;  %v3467_v15 = vld [vmem:[#allocation25_spill] sm:$0xff] }
 0x19d   :  { %v907_v3 = vadd.f32 %v903_v33, %v847_v39  ;;  %v914_v27 = vpop.permute.xlu1 %913  ;;  %v2993_v38 = vpop.permute.xlu0 %1084 }
 0x19e   :  { %v921_v13 = vsel %vm893_vm9, %v914_v27, %v2893_v23  ;;  %v935_v36 = vsub.f32 %v908_v1, %v2919_v16  ;;  %v3003_v16 = vrot.slane %v2793_v18, %v3467_v15 }
 0x19f   :  { %v928_v35 = vmul.f32 %v921_v13, %v2874_v53  ;;  %v936_v41 = vmul.f32 %v921_v13, %v2836_v4 }
 0x1a1   :  { %v932_v56 = vsub.f32 %v905_v63, %v928_v35  ;;  %v940_v21 = vadd.f32 %v936_v41, %v861_v24  ;;  %v918_v60 = vpop.permute.xlu1 %917 }
 0x1a2   :  { %v922_v46 = vsel %vm893_vm9, %v2893_v23, %v918_v60  ;;  %v923_v57 = vsel %vm893_vm9, %v918_v60, %v2910_v40  ;;  %v3009_v42 = vpop.permute.xlu0 %1143  ;;  %v3013_v40 = vrot.slane %v2845_v50, %v3467_v15 }
 0x1a3   :  { %v929_v9 = vmul.f32 %v922_v46, %v2874_v53  ;;  %v930_v39 = vmul.f32 %v923_v57, %v2874_v53  ;;  %v937_v24 = vmul.f32 %v922_v46, %v2836_v4  ;;  %v938_v37 = vmul.f32 %v923_v57, %v2836_v4 }
 0x1a4   :  { %v948_v23 = vadd.f32 %v944_v30, %v940_v21  ;;  %v1049_v53 = vmul.f32 %v1048_v28, %v2952_v25  ;;  %v1138_v4 = vmul.f32 %v3003_v16, %v2993_v38 }
 0x1a5   :  { %v933_v43 = vsub.f32 %v906_v31, %v929_v9  ;;  %v934_v54 = vsub.f32 %v907_v3, %v930_v39  ;;  %v941_v2 = vadd.f32 %v937_v24, %v862_v55  ;;  %v942_v48 = vadd.f32 %v938_v37, %v863_v8  ;;  %v970_v49 = vpop.permute.xlu1 %969 }
 0x1a6   :  { %v1043_v0 = vmul.f32 %v2939_v7, %v970_v49  ;;  %v1053_v29 = vmul.f32 %v1048_v28, %v970_v49  ;;  %v3019_v63 = vpop.permute.xlu0 %1093  ;;  %v3025_v55 = vmul.f32 %v3013_v40, %v2972_v10 }
 0x1a7   :  { %v950_v47 = vadd.f32 %v946_v19, %v942_v48  ;;  %v949_v30 = vadd.f32 %v945_v58, %v941_v2 }
 0x1a8   :  { %v1044_v14 = vadd.f32 %v1043_v0, %v2913_v61  ;;  %v1054_v31 = vsub.f32 %v2962_v22, %v1053_v29 }
 0x1a9   :  { %v975_v7 = vpop.permute.xlu1 %974 }
 0x1aa   :  { %v981_v8 = vsel %vm980_vm10, %v2926_v59, %v975_v7  ;;  %v982_v11 = vsel %vm980_vm10, %v975_v7, %v2933_v52  ;;  %v3031_v17 = vadd.f32 %v1049_v53, %v1044_v14  ;;  %v3033_v58 = vadd.f32 %v1138_v4, %v1054_v31  ;;  %v3037_v19 = vpop.permute.xlu0 %1230 }
 0x1ab   :  { %v988_v20 = vmul.f32 %v981_v8, %v970_v49  ;;  %v989_v33 = vmul.f32 %v982_v11, %v970_v49  ;;  %v1031_v61 = vmul.f32 %v2952_v25, %v981_v8  ;;  %v1032_v22 = vmul.f32 %v2952_v25, %v982_v11 }
 0x1ac   :  { %v1141_v1 = vsub.f32 %v3033_v58, %v3025_v55 }
 0x1ad   :  { %v992_v3 = vadd.f32 %v988_v20, %v932_v56  ;;  %v993_v59 = vadd.f32 %v989_v33, %v933_v43  ;;  %v979_v27 = vpop.permute.xlu1 %978 }
 0x1ae   :  { %v983_v13 = vsel %vm980_vm10, %v2933_v52, %v979_v27  ;;  %v991_v35 = vmul.f32 %v979_v27, %v970_v49  ;;  %v1034_v41 = vmul.f32 %v2952_v25, %v979_v27  ;;  %v3049_v15 = vpop.permute.xlu0 %1150 }
 0x1af   :  { %v990_v21 = vmul.f32 %v983_v13, %v970_v49  ;;  %v1033_v60 = vmul.f32 %v2952_v25, %v983_v13 }
 0x1b0   :  { %v3045_v46 = vadd.f32 %v991_v35, %v935_v36 }
 0x1b1   :  { %v3047_v57 = vadd.f32 %v990_v21, %v934_v54  ;;  %v1001_v28 = vpop.permute.xlu1 %1000 }
 0x1b2   :  { %v3056_v2 = vpop.permute.xlu0 %1174 }
 0x1b5   :  { %v1003_v9 = vpop.permute.xlu1 %1002 }
 0x1b6   :  { %v1008_v56 = vsel %vm980_vm10, %v1001_v28, %v1003_v9  ;;  %v1009_v39 = vsel %vm980_vm10, %v1003_v9, %v2966_v62 }
 0x1b7   :  { %v1015_v52 = vmul.f32 %v1008_v56, %v2952_v25  ;;  %v1016_v24 = vmul.f32 %v1009_v39, %v2952_v25  ;;  %v1023_v37 = vmul.f32 %v1008_v56, %v970_v49  ;;  %v1024_v43 = vmul.f32 %v1009_v39, %v970_v49 }
 0x1b9   :  { %v1019_v36 = vsub.f32 %v992_v3, %v1015_v52  ;;  %v1020_v54 = vsub.f32 %v993_v59, %v1016_v24  ;;  %v1027_v48 = vadd.f32 %v1023_v37, %v948_v23  ;;  %v1028_v0 = vadd.f32 %v1024_v43, %v949_v30  ;;  %v1007_v53 = vpop.permute.xlu1 %1006  ;;  %v3071_v3 = vpop.permute.xlu0 %1178 }
 0x1ba   :  { %v1010_v29 = vsel %vm980_vm10, %v2966_v62, %v1007_v53  ;;  %v3061_v4 = vmul.f32 %v1007_v53, %v2952_v25  ;;  %v1026_v14 = vmul.f32 %v1007_v53, %v970_v49 }
 0x1bb   :  { %v3064_v31 = vmul.f32 %v1010_v29, %v2952_v25  ;;  %v1025_v7 = vmul.f32 %v1010_v29, %v970_v49  ;;  %v1035_v8 = vadd.f32 %v1031_v61, %v1027_v48  ;;  %v1036_v11 = vadd.f32 %v1032_v22, %v1028_v0 }
 0x1bc   :  { %v1022_v20 = vsub.f32 %v3045_v46, %v3061_v4  ;;  %v1030_v23 = vadd.f32 %v1026_v14, %v2986_v26  ;;  %v1113_v49 = vmul.f32 %v3019_v63, %v2972_v10 }
 0x1bd   :  { %v1021_v30 = vsub.f32 %v3047_v57, %v3064_v31  ;;  %v1029_v33 = vadd.f32 %v1025_v7, %v950_v47  ;;  %v1060_v62 = vpop.permute.xlu1 %1059  ;;  %v3082_v13 = vpop.permute.xlu0 %1258 }
 0x1be   :  { %v1038_v59 = vadd.f32 %v1034_v41, %v1030_v23 }
 0x1bf   :  { %v3073_v27 = vadd.f32 %v1033_v60, %v1029_v33 }
 0x1c0   :  { %v1117_v60 = vadd.f32 %v1113_v49, %v1038_v59 }
 0x1c1   :  { %v1062_v25 = vpop.permute.xlu1 %1061  ;;  %v3091_v39 = vpop.permute.xlu0 %1233 }
 0x1c2   :  { %v1068_v61 = vsel %vm1067_vm11, %v1060_v62, %v1062_v25  ;;  %v1069_v26 = vsel %vm1067_vm11, %v1062_v25, %v2982_v45 }
 0x1c3   :  { %v1075_v22 = vmul.f32 %v1068_v61, %v2972_v10  ;;  %v1076_v47 = vmul.f32 %v1069_v26, %v2972_v10  ;;  %v1119_v14 = vmul.f32 %v2993_v38, %v1069_v26 }
 0x1c5   :  { %v3084_v35 = vadd.f32 %v1075_v22, %v1019_v36  ;;  %v3086_v41 = vadd.f32 %v1076_v47, %v1020_v54  ;;  %v1066_v21 = vpop.permute.xlu1 %1065  ;;  %v3095_v43 = vpop.permute.xlu0 %1237  ;;  %v1118_v54 = vmul.f32 %v2993_v38, %v1068_v61  ;;  %v1130_v22 = vmul.f32 %v3003_v16, %v2972_v10  ;;  %v3468_v47 = vld [vmem:[#allocation26_spill] sm:$0xff] }
 0x1c6   :  { %v1121_v28 = vmul.f32 %v2993_v38, %v1066_v21 }
 0x1c8   :  { %v3089_v9 = vadd.f32 %v1121_v28, %v1117_v60  ;;  %v1131_v60 = vadd.f32 %v1130_v22, %v3031_v17  ;;  %v1136_v28 = vmul.f32 %v3013_v40, %v2993_v38  ;;  %v1070_v40 = vsel %vm1067_vm11, %v2982_v45, %v1066_v21  ;;  %v3469_v22 = vld [vmem:[#allocation27_spill] sm:$0xff] }
 0x1c9   :  { %v1088_v56 = vpop.permute.xlu1 %1087  ;;  %v3105_v33 = vpop.permute.xlu0 %1261  ;;  %v1309_v45 = vrot.slane %v2845_v50, %v3469_v22  ;;  %v1077_v58 = vmul.f32 %v1070_v40, %v2972_v10 }
 0x1cd   :  { %v1090_v52 = vpop.permute.xlu1 %1089 }
 0x1ce   :  { %v1095_v24 = vsel %vm1067_vm11, %v1088_v56, %v1090_v52 }
 0x1cf   :  { %v1110_v37 = vmul.f32 %v1095_v24, %v2972_v10  ;;  %v1102_v46 = vmul.f32 %v1095_v24, %v2993_v38 }
 0x1d1   :  { %v1114_v36 = vadd.f32 %v1110_v37, %v1035_v8  ;;  %v1092_v48 = vpop.permute.xlu1 %1091  ;;  %v3109_v8 = vpop.permute.xlu0 %1265  ;;  %v1222_v37 = vrot.slane %v2845_v50, %v3468_v47 }
 0x1d2   :  { %v1096_v0 = vsel %vm1067_vm11, %v1090_v52, %v1092_v48 }
 0x1d3   :  { %v1111_v53 = vmul.f32 %v1096_v0, %v2972_v10  ;;  %v3100_v29 = vadd.f32 %v1118_v54, %v1114_v36  ;;  %v1137_v54 = vadd.f32 %v1136_v28, %v1131_v60  ;;  %v1227_v60 = vmul.f32 %v1222_v37, %v3009_v42 }
 0x1d4   :  { %v1103_v4 = vmul.f32 %v1096_v0, %v2993_v38 }
 0x1d5   :  { %v1115_v7 = vadd.f32 %v1111_v53, %v1036_v11  ;;  %v3103_v23 = vpop.permute.xlu1 %1171  ;;  %v3111_v49 = vpop.permute.xlu0 %1345  ;;  %v1216_v11 = vrot.slane %v2793_v18, %v3468_v47  ;;  %v1097_v53 = vsel %vm1067_vm11, %v1092_v48, %v3019_v63  ;;  %v1303_v47 = vrot.slane %v2793_v18, %v3469_v22 }
 0x1d7   :  { %v3107_v62 = vadd.f32 %v1119_v14, %v1115_v7  ;;  %v1225_v56 = vmul.f32 %v1216_v11, %v3103_v23  ;;  %v1217_v16 = vmul.f32 %v1216_v11, %v3009_v42  ;;  %v1078_v14 = vmul.f32 %v1066_v21, %v2972_v10 }
 0x1d8   :  { %v1223_v7 = vmul.f32 %v1222_v37, %v3103_v23  ;;  %v1112_v11 = vmul.f32 %v1097_v53, %v2972_v10  ;;  %v1312_v21 = vmul.f32 %v1303_v47, %v3082_v13  ;;  %v3157_v37 = vmul.f32 %v3019_v63, %v2993_v38 }
 0x1d9   :  { %v1147_v59 = vpop.permute.xlu1 %1146  ;;  %v3123_v52 = vpop.permute.xlu0 %1322  ;;  %v1226_v17 = vadd.f32 %v1225_v56, %v1141_v1  ;;  %v1218_v55 = vadd.f32 %v1217_v16, %v1137_v54  ;;  %v3153_v56 = vrot.slane %v2793_v18, %v2574_v34  ;;  %v3162_v54 = vadd.f32 %v1078_v14, %v1022_v20 }
 0x1da   :  { %v1304_v22 = vmul.f32 %v1303_v47, %v3037_v19  ;;  %v1314_v10 = vmul.f32 %v1309_v45, %v3037_v19  ;;  %v3176_v63 = vrot.slane %v2845_v50, %v2645_v44  ;;  %v1104_v20 = vmul.f32 %v1097_v53, %v2993_v38 }
 0x1db   :  { %v1228_v1 = vsub.f32 %v1226_v17, %v1227_v60  ;;  %v1224_v16 = vadd.f32 %v1223_v7, %v1218_v55  ;;  %v3168_v17 = vrot.slane %v2845_v50, %v2574_v34  ;;  %v3172_v60 = vrot.slane %v2793_v18, %v2645_v44 }
 0x1dc   :  { %v1116_v14 = vadd.f32 %v1112_v11, %v3073_v27  ;;  %v1081_v34 = vadd.f32 %v1077_v58, %v1021_v30  ;;  %v1120_v18 = vmul.f32 %v2993_v38, %v1070_v40  ;;  %v1310_v47 = vmul.f32 %v1309_v45, %v3082_v13 }
 0x1dd   :  { %v1149_v25 = vpop.permute.xlu1 %1148  ;;  %v3143_v48 = vpop.permute.xlu0 %1326  ;;  %v1313_v44 = vadd.f32 %v1312_v21, %v1228_v1  ;;  %v1109_v50 = vsub.f32 %v3162_v54, %v3157_v37  ;;  %v1305_v53 = vadd.f32 %v1304_v22, %v1224_v16  ;;  %v3202_v31 = vmul.f32 %v3168_v17, %v3111_v49 }
 0x1de   :  { %v1155_v57 = vsel %vm1154_vm12, %v1147_v59, %v1149_v25  ;;  %v1156_v38 = vsel %vm1154_vm12, %v1149_v25, %v3049_v15  ;;  %v1399_v30 = vmul.f32 %v3153_v56, %v3111_v49  ;;  %v1107_v40 = vsub.f32 %v3086_v41, %v1103_v4 }
 0x1df   :  { %v1124_v11 = vadd.f32 %v1120_v18, %v1116_v14  ;;  %v1315_v58 = vsub.f32 %v1313_v44, %v1314_v10  ;;  %v1162_v1 = vmul.f32 %v1155_v57, %v3009_v42  ;;  %v3219_v41 = vmul.f32 %v3111_v49, %v3143_v48 }
 0x1e0   :  { %v1311_v21 = vadd.f32 %v1310_v47, %v1305_v53  ;;  %v1205_v37 = vmul.f32 %v3103_v23, %v1155_v57  ;;  %v1206_v54 = vmul.f32 %v3103_v23, %v1156_v38 }
 0x1e1   :  { %v3113_v61 = vpop.permute.xlu1 %1152  ;;  %v3195_v0 = vpop.permute.xlu0 %1350  ;;  %v3243_v47 = vadd.f32 %v1399_v30, %v1315_v58 }
 0x1e2   :  { %v1157_v59 = vsel %vm1154_vm12, %v3049_v15, %v3113_v61  ;;  %v1165_v10 = vmul.f32 %v3113_v61, %v3009_v42 }
 0x1e3   :  { %v1164_v22 = vmul.f32 %v1157_v59, %v3009_v42  ;;  %v1207_v57 = vmul.f32 %v3103_v23, %v1157_v59 }
 0x1e5   :  { %v1177_v26 = vpop.permute.xlu1 %1176 }
 0x1e6   :  { %v1182_v24 = vsel %vm1154_vm12, %v3056_v2, %v1177_v26  ;;  %v1183_v27 = vsel %vm1154_vm12, %v1177_v26, %v3071_v3  ;;  %v1106_v2 = vsub.f32 %v3084_v35, %v1102_v46  ;;  %v1108_v26 = vsub.f32 %v1081_v34, %v1104_v20  ;;  %v3235_v20 = vpop.permute.xlu0 %1354 }
 0x1e7   :  { %v1197_v25 = vmul.f32 %v1182_v24, %v3009_v42  ;;  %v1198_v45 = vmul.f32 %v1183_v27, %v3009_v42  ;;  %v1163_v35 = vmul.f32 %v1156_v38, %v3009_v42  ;;  %v1189_v46 = vmul.f32 %v1182_v24, %v3103_v23 }
 0x1e8   :  { %v3233_v4 = vmul.f32 %v1183_v27, %v3103_v23  ;;  %v3241_v18 = vmul.f32 %v3235_v20, %v3111_v49  ;;  %v1166_v44 = vadd.f32 %v1162_v1, %v1106_v2 }
 0x1e9   :  { %v3127_v36 = vpop.permute.xlu1 %1180  ;;  %v1201_v34 = vadd.f32 %v1197_v25, %v3100_v29  ;;  %v1167_v53 = vadd.f32 %v1163_v35, %v1107_v40  ;;  %v1208_v29 = vmul.f32 %v3103_v23, %v3113_v61  ;;  %v1168_v25 = vadd.f32 %v1164_v22, %v1108_v26 }
 0x1ea   :  { %v1184_v15 = vsel %vm1154_vm12, %v3071_v3, %v3127_v36  ;;  %v1200_v16 = vmul.f32 %v3127_v36, %v3009_v42  ;;  %v1202_v3 = vadd.f32 %v1198_v45, %v3107_v62  ;;  %v1192_v24 = vmul.f32 %v3127_v36, %v3103_v23 }
 0x1eb   :  { %v1199_v27 = vmul.f32 %v1184_v15, %v3009_v42  ;;  %v1191_v62 = vmul.f32 %v1184_v15, %v3103_v23  ;;  %v1169_v45 = vadd.f32 %v1165_v10, %v1109_v50  ;;  %v1193_v30 = vsub.f32 %v1166_v44, %v1189_v46 }
 0x1ec   :  { %v1204_v38 = vadd.f32 %v1200_v16, %v3089_v9  ;;  %v1194_v2 = vsub.f32 %v1167_v53, %v3233_v4  ;;  %v1209_v42 = vadd.f32 %v1205_v37, %v1201_v34  ;;  %v1210_v58 = vadd.f32 %v1206_v54, %v1202_v3 }
 0x1ed   :  { %v3145_v28 = vpop.permute.xlu1 %1317  ;;  %v1196_v1 = vsub.f32 %v1169_v45, %v1192_v24  ;;  %v1203_v61 = vadd.f32 %v1199_v27, %v1124_v11  ;;  %v1195_v50 = vsub.f32 %v1168_v25, %v1191_v62 }
 0x1ee   :  { %v1212_v35 = vadd.f32 %v1208_v29, %v1204_v38  ;;  %v1391_v54 = vmul.f32 %v3153_v56, %v3145_v28  ;;  %v3277_v16 = vmul.f32 %v3168_v17, %v3145_v28 }
 0x1ef   :  { %v1211_v4 = vadd.f32 %v1207_v57, %v1203_v61 }
 0x1f0   :  { %v1392_v27 = vadd.f32 %v1391_v54, %v1311_v21  ;;  %v1402_v57 = vsub.f32 %v3243_v47, %v3277_v16 }
 0x1f1   :  { %v3182_v7 = vpop.permute.xlu1 %1235 }
 0x1f2   :  { %v1242_v26 = vsel %vm1241_vm13, %v3091_v39, %v3182_v7  ;;  %v1243_v37 = vsel %vm1241_vm13, %v3182_v7, %v3095_v43  ;;  %v1374_v7 = vmul.f32 %v3235_v20, %v3145_v28 }
 0x1f3   :  { %v1250_v56 = vmul.f32 %v1243_v37, %v3037_v19 }
 0x1f5   :  { %v3208_v55 = vpop.permute.xlu1 %1239 }
 0x1f6   :  { %v1252_v36 = vmul.f32 %v3208_v55, %v3037_v19  ;;  %v1244_v11 = vsel %vm1241_vm13, %v3095_v43, %v3208_v55  ;;  %v1249_v43 = vmul.f32 %v1242_v26, %v3037_v19  ;;  %v1295_v17 = vmul.f32 %v3082_v13, %v3208_v55 }
 0x1f7   :  { %v1251_v44 = vmul.f32 %v1244_v11, %v3037_v19  ;;  %v1292_v55 = vmul.f32 %v3082_v13, %v1242_v26 }
 0x1f8   :  { %v1256_v39 = vadd.f32 %v1252_v36, %v1196_v1  ;;  %v1253_v45 = vadd.f32 %v1249_v43, %v1193_v30  ;;  %v1254_v36 = vadd.f32 %v1250_v56, %v1194_v2  ;;  %v1398_v30 = vadd.f32 %v3202_v31, %v1392_v27  ;;  %v1604_v31 = vld [vmem:[#allocation5 + $0x10] sm:$0xff] }
 0x1f9   :  { %v1264_v14 = vpop.permute.xlu1 %1263  ;;  %v1255_v61 = vadd.f32 %v1251_v44, %v1195_v50 }
 0x1fa   :  { %v1269_v23 = vsel %vm1241_vm13, %v3105_v33, %v1264_v14  ;;  %v1270_v9 = vsel %vm1241_vm13, %v1264_v14, %v3109_v8  ;;  %v1339_v14 = vmul.f32 %v3143_v48, %v3145_v28 }
 0x1fb   :  { %v1284_v22 = vmul.f32 %v1269_v23, %v3037_v19  ;;  %v1285_v10 = vmul.f32 %v1270_v9, %v3037_v19  ;;  %v1276_v53 = vmul.f32 %v1269_v23, %v3082_v13  ;;  %v1277_v29 = vmul.f32 %v1270_v9, %v3082_v13 }
 0x1fc   :  { %v1294_v23 = vmul.f32 %v3082_v13, %v1244_v11 }
 0x1fd   :  { %v1268_v40 = vpop.permute.xlu1 %1267  ;;  %v1288_v62 = vadd.f32 %v1284_v22, %v1209_v42  ;;  %v1289_v38 = vadd.f32 %v1285_v10, %v1210_v58  ;;  %v1280_v42 = vsub.f32 %v1253_v45, %v1276_v53  ;;  %v1281_v9 = vsub.f32 %v1254_v36, %v1277_v29 }
 0x1fe   :  { %v1287_v59 = vmul.f32 %v1268_v40, %v3037_v19  ;;  %v1279_v15 = vmul.f32 %v1268_v40, %v3082_v13  ;;  %v1271_v34 = vsel %vm1241_vm13, %v3109_v8, %v1268_v40 }
 0x1ff   :  { %v1278_v8 = vmul.f32 %v1271_v34, %v3082_v13  ;;  %v1286_v40 = vmul.f32 %v1271_v34, %v3037_v19 }
 0x200   :  { %v1291_v46 = vadd.f32 %v1287_v59, %v1212_v35  ;;  %v1283_v3 = vsub.f32 %v1256_v39, %v1279_v15  ;;  %v1293_v59 = vmul.f32 %v3082_v13, %v1243_v37  ;;  %v1296_v35 = vadd.f32 %v1292_v55, %v1288_v62 }
 0x201   :  { %v3271_v33 = vpop.permute.xlu1 %1404  ;;  %v1282_v54 = vsub.f32 %v1255_v61, %v1278_v8  ;;  %v1290_v19 = vadd.f32 %v1286_v40, %v1211_v4 }
 0x202   :  { %v1299_v25 = vadd.f32 %v1295_v17, %v1291_v46  ;;  %v1343_v1 = vadd.f32 %v1339_v14, %v1283_v3  ;;  %v1297_v15 = vadd.f32 %v1293_v59, %v1289_v38  ;;  %v1409_v50 = vmul.f32 %v2745_v51, %v3271_v33  ;;  %v1605_v46 = vld [vmem:[#allocation5 + $0x8] sm:$0xff]  ;;  %v1606_v3 = vld [vmem:[#allocation5 + $0x18] sm:$0xff] }
 0x203   :  { %v1431_v11 = vmul.f32 %v1604_v31, %v3271_v33  ;;  %v1410_v10 = vmul.f32 %v3271_v33, %v1891_v5  ;;  %v1412_v4 = vmul.f32 %v3271_v33, %v1895_v6  ;;  %v1298_v44 = vadd.f32 %v1294_v23, %v1290_v19 }
 0x204   :  { %v1378_v26 = vadd.f32 %v1374_v7, %v1299_v25  ;;  %v1370_v39 = vsub.f32 %v1343_v1, %v3241_v18  ;;  %v1411_v7 = vmul.f32 %v1605_v46, %v3271_v33  ;;  %v1451_v18 = vmul.f32 %v3172_v60, %v3271_v33 }
 0x205   :  { %v1321_v24 = vpop.permute.xlu1 %1320 }
 0x206   :  { %v1329_v21 = vsel %vm1328_vm14, %v1321_v24, %v3123_v52  ;;  %v1416_v53 = vadd.f32 %v1412_v4, %v1370_v39  ;;  %v1434_v24 = vmul.f32 %v3271_v33, %v1911_v12  ;;  %v1452_v25 = vadd.f32 %v1451_v18, %v1398_v30 }
 0x207   :  { %v1336_v2 = vmul.f32 %v1329_v21, %v3145_v28  ;;  %v1379_v27 = vmul.f32 %v3111_v49, %v1329_v21 }
 0x209   :  { %v1325_v58 = vpop.permute.xlu1 %1324  ;;  %v1340_v14 = vadd.f32 %v1336_v2, %v1280_v42 }
 0x20a   :  { %v1330_v37 = vsel %vm1328_vm14, %v3123_v52, %v1325_v58  ;;  %v1331_v13 = vsel %vm1328_vm14, %v1325_v58, %v3143_v48  ;;  %v1432_v52 = vmul.f32 %v3271_v33, %v3460_v32  ;;  %v1386_v48 = vadd.f32 %v3219_v41, %v1378_v26 }
 0x20b   :  { %v1337_v51 = vmul.f32 %v1330_v37, %v3145_v28  ;;  %v1338_v56 = vmul.f32 %v1331_v13, %v3145_v28  ;;  %v1433_v41 = vmul.f32 %v1606_v3, %v3271_v33  ;;  %v1380_v21 = vmul.f32 %v3111_v49, %v1330_v37 }
 0x20c   :  { %v1438_v40 = vadd.f32 %v1434_v24, %v1386_v48  ;;  %v1381_v23 = vmul.f32 %v3111_v49, %v1331_v13 }
 0x20d   :  { %v1349_v22 = vpop.permute.xlu1 %1348  ;;  %v1341_v45 = vadd.f32 %v1337_v51, %v1281_v9  ;;  %v1342_v36 = vadd.f32 %v1338_v56, %v1282_v54 }
 0x20e   :  { %v1356_v43 = vsel %vm1328_vm14, %v1349_v22, %v3195_v0 }
 0x20f   :  { %v1363_v17 = vmul.f32 %v1356_v43, %v3111_v49  ;;  %v1371_v34 = vmul.f32 %v1356_v43, %v3145_v28 }
 0x211   :  { %v1367_v29 = vsub.f32 %v1340_v14, %v1363_v17  ;;  %v1375_v62 = vadd.f32 %v1371_v34, %v1296_v35  ;;  %v1353_v38 = vpop.permute.xlu1 %1352 }
 0x212   :  { %v1357_v55 = vsel %vm1328_vm14, %v3195_v0, %v1353_v38  ;;  %v1358_v8 = vsel %vm1328_vm14, %v1353_v38, %v3235_v20 }
 0x213   :  { %v1383_v59 = vadd.f32 %v1379_v27, %v1375_v62  ;;  %v1364_v1 = vmul.f32 %v1357_v55, %v3111_v49  ;;  %v1365_v61 = vmul.f32 %v1358_v8, %v3111_v49  ;;  %v1372_v42 = vmul.f32 %v1357_v55, %v3145_v28 }
 0x214   :  { %v1373_v58 = vmul.f32 %v1358_v8, %v3145_v28  ;;  %v1413_v0 = vadd.f32 %v1409_v50, %v1367_v29  ;;  %v1607_v28 = vld [vmem:[#allocation5] sm:$0xff] }
 0x215   :  { %v1435_v30 = vadd.f32 %v1431_v11, %v1383_v59  ;;  %v1368_v9 = vsub.f32 %v1341_v45, %v1364_v1  ;;  %v1369_v20 = vsub.f32 %v1342_v36, %v1365_v61  ;;  %v1419_v26 = vpop.permute.xlu1 %1418  ;;  %v1376_v35 = vadd.f32 %v1372_v42, %v1297_v15 }
 0x216   :  { %v1377_v54 = vadd.f32 %v1373_v58, %v1298_v44  ;;  %v1423_v19 = vmul.f32 %v1604_v31, %v1419_v26  ;;  %v1424_v2 = vmul.f32 %v1419_v26, %v3460_v32  ;;  %v1425_v37 = vmul.f32 %v1606_v3, %v1419_v26 }
 0x217   :  { %v1414_v39 = vadd.f32 %v1410_v10, %v1368_v9  ;;  %v1415_v22 = vadd.f32 %v1411_v7, %v1369_v20  ;;  %v1426_v49 = vmul.f32 %v1419_v26, %v1911_v12  ;;  %v1384_v13 = vadd.f32 %v1380_v21, %v1376_v35 }
 0x218   :  { %v1385_v18 = vadd.f32 %v1381_v23, %v1377_v54  ;;  %v1427_v48 = vsub.f32 %v1413_v0, %v1423_v19  ;;  %v1439_v51 = vmul.f32 %v1607_v28, %v1419_v26  ;;  %v1440_v4 = vmul.f32 %v1419_v26, %v1891_v5 }
 0x219   :  { %v1428_v50 = vsub.f32 %v1414_v39, %v1424_v2  ;;  %v1429_v11 = vsub.f32 %v1415_v22, %v1425_v37  ;;  %v1430_v43 = vsub.f32 %v1416_v53, %v1426_v49  ;;  %v1436_v15 = vadd.f32 %v1432_v52, %v1384_v13 }
 0x21a   :  { %v1437_v14 = vadd.f32 %v1433_v41, %v1385_v18  ;;  %v1441_v31 = vmul.f32 %v1605_v46, %v1419_v26  ;;  %v1442_v32 = vmul.f32 %v1419_v26, %v1895_v6  ;;  %v1443_v12 = vadd.f32 %v1439_v51, %v1435_v30 }
 0x21b   :  { %v1467_v7 = vcombine.low %v1427_v48, %v1428_v50  ;;  %v1468_v56 = vcombine.low %v1429_v11, %v1430_v43  ;;  %v1457_v17 = vmul.f32 %v3176_v63, %v1419_v26  ;;  %v1444_v34 = vadd.f32 %v1440_v4, %v1436_v15 }
 0x21c   :  { %v1445_v5 = vadd.f32 %v1441_v31, %v1437_v14  ;;  %v1446_v52 = vadd.f32 %v1442_v32, %v1438_v40  ;;  %v1459_v46 = vmul.f32 %v3172_v60, %v1419_v26  ;;  %v1461_v53 = vmul.f32 %v3176_v63, %v3271_v33 }
 0x21d   :  { %1471 = vst [vmem:[#allocation10] sm:$0xff] %v1467_v7  ;;  %1475 = vst.msk [vmem:[#allocation10 + $0x8] sm:$0xff] %vm3349_vm2, %v1468_v56  ;;  %v1458_v6 = vadd.f32 %v1457_v17, %v1452_v25  ;;  %v1480_v3 = vcombine.low %v1443_v12, %v1444_v34 }
 0x21e   :  { %v1481_v41 = vcombine.low %v1445_v5, %v1446_v52  ;;  %v1460_v44 = vadd.f32 %v1459_v46, %v1402_v57 }
 0x21f   :  { %1488 = vst.msk [vmem:[#allocation11] sm:$0xf] %vm1487_vm1, %v1458_v6  ;;  %1485 = vst [vmem:[#allocation10 + $0x10] sm:$0xff] %v1480_v3 }
 0x220   :  { %1486 = vst.msk [vmem:[#allocation10 + $0x18] sm:$0xff] %vm3349_vm2, %v1481_v41  ;;  %v1462_v60 = vsub.f32 %v1460_v44, %v1461_v53 }
 0x221   :  { %1707 = shalt.err (!%p1704_p8)
}
 0x222   :  { %s1708_s20 = scalar_lea.hbm %s3407_s4, 512 }
 0x223   :  { %p1709_p9 = scmp.ne.s32.totalorder %s3407_s4, %s1708_s20  ;;  %p1712_p10 = scmp.lt.u32.totalorder %s1708_s20, %s3407_s4 }
 0x225   :  { %p1714_p11 = pnand %p1712_p10, %p1709_p9 }
 0x227   :  { %1717 = shalt.err (!%p1714_p11)
}
 0x228   :  { %1502 = dma.vmem_to_hbm [thread:$0]  %s1497_s13, 512, %s3407_s4, [#allocation4], %s1751_s28, %s1751_s28, %s1752_s29   ;;  %1490 = vst.msk [vmem:[#allocation11 + $0x4] sm:$0xf] %vm1487_vm1, %v1462_v60 }
 0x229   :  { %s1718_s25 = scalar_lea.vmem %s3365_s15, 128  ;;  %p1723_p13 = scmp.lt.s32.totalorder %s3365_s15, %s3365_s15 }
 0x22a   :  { %p1719_p12 = scmp.ne.s32.totalorder %s3365_s15, %s1718_s25  ;;  %p1724_p0 = scmp.lt.s32.totalorder %s1718_s25, %s1718_s25 }
 0x22c   :  { %p1725_p1 = por %p1724_p0, %p1723_p13 }
 0x22e   :  { %p1726_p2 = pnand %p1725_p1, %p1719_p12 }
 0x230   :  { %1729 = shalt.err (!%p1726_p2)
}
 0x231   :  { %s1730_s30 = scalar_lea.hbm %s3408_s5, 128 }
 0x232   :  { %p1731_p3 = scmp.ne.s32.totalorder %s3408_s5, %s1730_s30  ;;  %p1734_p4 = scmp.lt.u32.totalorder %s1730_s30, %s3408_s5 }
 0x234   :  { %p1736_p5 = pnand %p1734_p4, %p1731_p3 }
 0x236   :  { %1739 = shalt.err (!%p1736_p5)
}
 0x237   :  { %1514 = dma.vmem_to_hbm [thread:$0]  %s3365_s15, 128, %s3408_s5, [#allocation12], %s1754_s1, %s1754_s1, %s1755_s17  }
 0x238   :  { %1746 = dma.done.wait [#allocation4], 512  }
 0x239   :  { %1747 = vsyncadd [#allocation4], 4294966784 }
 0x23a   :  { %1748 = dma.done.wait [#allocation12], 128  }
 0x23b   :  { %1749 = vsyncadd [#allocation12], 4294967168 }
 0x23c   :  { %1521 = vsyncpa [#allocation3], 1 }
 0x23d   :  { %1522 = vsyncpa [#allocation6], 1 }
 0x23e   :  { %1523 = vsyncpa [#allocation9], 1 }
 0x23f   :  { %1524 = vsyncpa [#allocation4], 1 }
 0x240   :  { %1525 = vsyncpa [#allocation12], 1 }

</bundles_post_ra>
